<compile_context>
chip_gen: v5e
topology: v5e:2x2
jax: 0.10.0
libtpu: 0.0.40
codegen_flags: <defaults>
</compile_context>

<pallas_src>
import functools

import jax
import jax.numpy as jnp
from jax import lax
from jax.experimental import pallas as pl
from jax.experimental.pallas import tpu as pltpu


def _round_up(x, m):
    return (x + m - 1) // m * m


def _vq_kernel(x_ref, et_ref, esqh_ref, q_ref, part_ref, ind_ref, *,
               tile_n, n_tok, k_pad, k_chunk, ragged):
    """One token tile of VQ nearest-codeword search + gather.

    x_ref    : [tile_n, D]      input rows (ragged last tile: OOB rows undefined)
    et_ref   : [k_pad, D]       codebook transpose, VMEM-resident
    esqh_ref : [k_pad, 1]       0.5*||e_k||^2 (f32), +inf for padded codewords
    q_ref    : [tile_n, D]      quantized rows
    part_ref : [1, 1, 1]        per-tile sum((q - x)^2) over valid rows (f32)
    ind_ref  : [1, 1, tile_n]   nearest-code indices, lane-dense int32
    """
    x = x_ref[...]                       # native dtype (f32 or bf16) -> MXU native
    cdt = x.dtype

    chunks = [(o, min(k_chunk, k_pad - o)) for o in range(0, k_pad, k_chunk)]

    # ---- pass 1: running min / argmin over codebook chunks ----------------
    # dist[k, n] = 0.5*||e_k||^2 - <x_n, e_k>   (argmin-equivalent distance)
    run_min = None
    run_ind = None
    for off, sz in chunks:
        et_c = et_ref[off:off + sz, :]                               # [sz, D]
        xe_t = lax.dot_general(et_c, x, (((1,), (1,)), ((), ())),
                               preferred_element_type=jnp.float32)   # [sz, tn]
        dist = esqh_ref[off:off + sz, :] - xe_t                      # [sz, tn] f32
        min_c = jnp.min(dist, axis=0, keepdims=True)                 # [1, tn]
        rows = lax.broadcasted_iota(jnp.int32, dist.shape, 0) + off
        ind_c = jnp.min(jnp.where(dist == min_c, rows, k_pad),
                        axis=0, keepdims=True)                       # [1, tn]
        if run_min is None:
            run_min, run_ind = min_c, ind_c
        else:
            better = min_c < run_min      # strict: earlier chunk wins ties
            run_min = jnp.where(better, min_c, run_min)
            run_ind = jnp.where(better, ind_c, run_ind)

    # Index output is lane-dense for free in this orientation (no extra matmul,
    # no relayout).
    ind_ref[...] = run_ind.reshape(1, 1, tile_n)

    # ---- pass 2: gather the winning codewords via chunked one-hot matmuls --
    q = None
    for off, sz in chunks:
        rows = lax.broadcasted_iota(jnp.int32, (sz, tile_n), 0) + off
        onehot = (rows == run_ind).astype(cdt)                       # [sz, tn]
        q_c = lax.dot_general(onehot, et_ref[off:off + sz, :],
                              (((0,), (0,)), ((), ())),
                              preferred_element_type=jnp.float32)    # [tn, D]
        q = q_c if q is None else q + q_c
    q_ref[...] = q.astype(q_ref.dtype)

    # ---- per-tile partial squared error ------------------------------------
    # Only the ragged last tile pays for row masking; steady-state tiles take
    # the unmasked path (mask built from a (tile_n, 1) iota, not (tile_n, D)).
    x32 = x.astype(jnp.float32)
    if not ragged:
        d = q - x32
        part_ref[...] = jnp.sum(d * d).reshape(1, 1, 1)
    else:
        pid = pl.program_id(0)
        last = pl.num_programs(0) - 1

        @pl.when(pid != last)
        def _():
            d = q - x32
            part_ref[...] = jnp.sum(d * d).reshape(1, 1, 1)

        @pl.when(pid == last)
        def _():
            row = pid * tile_n + lax.broadcasted_iota(jnp.int32, (tile_n, 1), 0)
            d = jnp.where(row < n_tok, q - x32, 0.0)
            part_ref[...] = jnp.sum(d * d).reshape(1, 1, 1)


def _vmem_limit_bytes():
    """Generation-aware VMEM limit (v7x has 64 MiB/TC vs 128 MiB on v5e/v6e)."""
    try:
        cap = int(pltpu.get_tpu_info().vmem_capacity_bytes)
    except Exception:
        cap = 64 * 1024 * 1024          # assume the smallest (v7x per-TC)
    return min(cap * 3 // 4, 112 * 1024 * 1024)


def _choose_tiling(n_tok, dim, k_pad, x_itemsize, e_itemsize, budget,
                   max_tile_n=None, max_k_chunk=None):
    tile_n = min(max_tile_n or 1024, _round_up(n_tok, 8))
    tile_n = max(_round_up(tile_n, 8), 8)
    k_chunk = min(max_k_chunk or 2048, k_pad)
    k_chunk = max((k_chunk // 8) * 8, 8)

    def usage(tn, kc):
        u = 2 * 2 * tn * dim * x_itemsize          # x-in + q-out, double-buffered
        u += 2 * (tn * 4 + 8 * 128 * 4)            # ind + partial-loss out blocks
        u += k_pad * dim * e_itemsize              # resident codebook (1 buffer)
        u += k_pad * 128 * 4                       # resident 0.5*||e||^2 (lane-padded)
        u += 6 * kc * tn * 4                       # dist / iota / onehot temporaries
        u += 3 * tn * dim * 4                      # f32 q accumulator, x32, diff
        return u

    # Prefer shrinking the codebook chunk before the token tile (keeps the
    # q/ind blocks large and lane-dense; K-chunking bounds the temporaries).
    while usage(tile_n, k_chunk) > budget and k_chunk > 256:
        k_chunk = max(256, k_chunk // 2)
    while usage(tile_n, k_chunk) > budget and tile_n > 128:
        tile_n = max(128, tile_n // 2)
    return tile_n, k_chunk


def quantize_forward(x, embed, *, beta=0.45, max_tile_n=None, max_k_chunk=None):
    """Eval-mode forward of the Quantize module (mask=None path).

    x     : [B, T, D]  (any leading shape; last dim = D).  f32 or bf16.
    embed : [D, K]     codebook.
    returns (quantize [B,T,D], diff scalar, embed_ind [B,T] int32)
    """
    orig_shape = x.shape
    dim, n_embed = embed.shape
    flat = x.reshape(-1, dim)
    n_tok = flat.shape[0]

    # --- codebook prep (hoisted, one-time) ----------------------------------
    # Transpose to [K, D], match the input dtype (so bf16 inputs get native
    # bf16 MXU matmuls), pad K to a multiple of 128 (padded codewords get +inf
    # half-norms), and fold the 2x of the cross term into the hoisted norms.
    embed_t = jnp.transpose(embed).astype(x.dtype)                  # [K, D]
    e_sq_half = 0.5 * jnp.sum(embed_t.astype(jnp.float32) ** 2,
                              axis=1, keepdims=True)                # [K, 1] f32
    k_pad = _round_up(n_embed, 128)
    if k_pad != n_embed:
        embed_t = jnp.pad(embed_t, ((0, k_pad - n_embed), (0, 0)))
        e_sq_half = jnp.pad(e_sq_half, ((0, k_pad - n_embed), (0, 0)),
                            constant_values=jnp.inf)

    # --- tiling / VMEM budget ------------------------------------------------
    vmem_limit = _vmem_limit_bytes()
    tile_n, k_chunk = _choose_tiling(
        n_tok, dim, k_pad,
        jnp.dtype(x.dtype).itemsize, jnp.dtype(embed_t.dtype).itemsize,
        vmem_limit - 12 * 1024 * 1024,          # headroom for Mosaic scratch
        max_tile_n=max_tile_n, max_k_chunk=max_k_chunk)
    num_tiles = pl.cdiv(n_tok, tile_n)
    ragged = (n_tok % tile_n) != 0              # no jnp.pad of x: Pallas handles
                                                # the ragged boundary block

    kernel = functools.partial(_vq_kernel, tile_n=tile_n, n_tok=n_tok,
                               k_pad=k_pad, k_chunk=k_chunk, ragged=ragged)

    x_bytes = jnp.dtype(x.dtype).itemsize
    cost = pl.CostEstimate(
        flops=4 * n_tok * k_pad * dim,                  # distance + gather matmuls
        transcendentals=0,
        bytes_accessed=(2 * n_tok * dim * x_bytes
                        + k_pad * dim * jnp.dtype(embed_t.dtype).itemsize
                        + k_pad * 4 + n_tok * 4 + num_tiles * 4))

    out_shape = (
        jax.ShapeDtypeStruct((n_tok, dim), x.dtype),                # quantized rows
        jax.ShapeDtypeStruct((num_tiles, 1, 1), jnp.float32),       # partial losses
        jax.ShapeDtypeStruct((num_tiles, 1, tile_n), jnp.int32),    # indices
    )

    def _call(single_buffer_codebook):
        cb_kwargs = {}
        if single_buffer_codebook:
            # Resident operands (constant index_map) need only one buffer.
            cb_kwargs = dict(pipeline_mode=pl.Buffered(1))
        grid_spec = pltpu.PrefetchScalarGridSpec(
            num_scalar_prefetch=0,
            grid=(num_tiles,),
            in_specs=[
                pl.BlockSpec((tile_n, dim), lambda i: (i, 0)),              # x tile
                pl.BlockSpec((k_pad, dim), lambda i: (0, 0), **cb_kwargs),  # codebook^T
                pl.BlockSpec((k_pad, 1), lambda i: (0, 0), **cb_kwargs),    # 0.5*||e||^2
            ],
            out_specs=[
                pl.BlockSpec((tile_n, dim), lambda i: (i, 0)),              # q tile
                pl.BlockSpec((1, 1, 1), lambda i: (i, 0, 0)),               # partial loss
                pl.BlockSpec((1, 1, tile_n), lambda i: (i, 0, 0)),          # indices
            ],
        )
        return pl.pallas_call(
            kernel,
            out_shape=out_shape,
            grid_spec=grid_spec,
            compiler_params=pltpu.CompilerParams(
                dimension_semantics=("parallel",),
                vmem_limit_bytes=vmem_limit),
            cost_estimate=cost,
        )(flat, embed_t, e_sq_half)

    try:
        q, parts, ind_tiles = _call(True)
    except Exception:
        # pl.Buffered(1) not accepted by this JAX version: fall back to the
        # default double-buffered resident codebook (correctness unchanged).
        q, parts, ind_tiles = _call(False)

    quantize = q.reshape(orig_shape)
    embed_ind = ind_tiles.reshape(-1)[:n_tok].reshape(orig_shape[:-1])
    # diff = codebook_loss + beta * commit_loss; both equal mean((q - x)^2) in
    # forward value, averaged over the ORIGINAL (unpadded) element count.
    diff = (1.0 + beta) * jnp.sum(parts) / jnp.float32(n_tok * dim)
    return quantize, diff, embed_ind


def _reference(x, embed, beta=0.45):
    """Pure-JAX reference matching the PyTorch forward (eval mode, no mask)."""
    dim = embed.shape[0]
    flat = x.reshape(-1, dim).astype(jnp.float32)
    emb = embed.astype(jnp.float32)
    dist = (jnp.sum(flat ** 2, axis=1, keepdims=True)
            - 2.0 * flat @ emb
            + jnp.sum(emb ** 2, axis=0, keepdims=True))
    ind = jnp.argmin(dist, axis=1)
    q = emb.T[ind].reshape(x.shape)
    mse = jnp.mean((q - x.astype(jnp.float32)) ** 2)
    return q, (1.0 + beta) * mse, ind.reshape(x.shape[:-1])


if __name__ == "__main__":
    B, T, DIM, N_EMBED = 2, 8, 32, 64
    BETA = 0.45

    key = jax.random.PRNGKey(0)
    kx, ke, kx2, ke2 = jax.random.split(key, 4)

    # Deterministic codebook init (kaiming-uniform-like bound).
    bound = (6.0 / N_EMBED) ** 0.5
    embed = jax.random.uniform(ke, (DIM, N_EMBED), jnp.float32,
                               minval=-bound, maxval=bound)
    x = jax.random.normal(kx, (B, T, DIM), jnp.float32)

    q, diff, ind = quantize_forward(x, embed, beta=BETA)
    jax.block_until_ready((q, diff, ind))

    q_ref, diff_ref, ind_ref = _reference(x, embed, BETA)
    assert jnp.allclose(q, q_ref, atol=1e-5), "quantize mismatch"
    assert jnp.allclose(diff, diff_ref, atol=1e-5), "diff mismatch"
    assert jnp.array_equal(ind, ind_ref), "index mismatch"

    # Second tiny check exercising the ragged-last-tile and K-chunked paths.
    embed2 = jax.random.uniform(ke2, (DIM, 256), jnp.float32,
                                minval=-bound, maxval=bound)
    x2 = jax.random.normal(kx2, (3, 5, DIM), jnp.float32)
    q2, diff2, ind2 = quantize_forward(x2, embed2, beta=BETA,
                                       max_tile_n=8, max_k_chunk=128)
    jax.block_until_ready((q2, diff2, ind2))
    q2r, diff2r, ind2r = _reference(x2, embed2, BETA)
    assert jnp.allclose(q2, q2r, atol=1e-5), "quantize mismatch (ragged/chunked)"
    assert jnp.allclose(diff2, diff2r, atol=1e-5), "diff mismatch (ragged/chunked)"
    assert jnp.array_equal(ind2, ind2r), "index mismatch (ragged/chunked)"

    print("KERNEL_OK")
</pallas_src>

<mosaic_0001>
module attributes {stable_mosaic.version = 11 : i64} {
  func.func @_vq_kernel(%arg0: i32, %arg1: memref<16x32xf32, #tpu.memory_space<vmem>>, %arg2: memref<128x32xf32, #tpu.memory_space<vmem>>, %arg3: memref<128x1xf32, #tpu.memory_space<vmem>>, %arg4: memref<16x32xf32, #tpu.memory_space<vmem>>, %arg5: memref<1x1x1xf32, #tpu.memory_space<vmem>>, %arg6: memref<1x1x16xi32, #tpu.memory_space<vmem>>) attributes {dimension_semantics = [#tpu.dimension_semantics<parallel>], iteration_bounds = array<i64: 1>, scalar_prefetch = 0 : i64, scratch_operands = 0 : i64, tpu.core_type = #tpu.core_type<tc>, window_params = [{transform_indices = @transform_0, window_bounds = array<i64: 16, 32>}, {pipeline_mode = #tpu.pipeline_mode<synchronous>, transform_indices = @transform_1, window_bounds = array<i64: 128, 32>}, {pipeline_mode = #tpu.pipeline_mode<synchronous>, transform_indices = @transform_2, window_bounds = array<i64: 128, 1>}, {transform_indices = @transform_3, window_bounds = array<i64: 16, 32>}, {transform_indices = @transform_4, window_bounds = array<i64: 1, 1, 1>}, {transform_indices = @transform_5, window_bounds = array<i64: 1, 1, 16>}]} {
    %c0 = arith.constant 0 : index
    %c0_0 = arith.constant 0 : index
    %0 = vector.load %arg1[%c0, %c0_0] : memref<16x32xf32, #tpu.memory_space<vmem>>, vector<16x32xf32>
    %c0_1 = arith.constant 0 : index
    %c0_2 = arith.constant 0 : index
    %1 = vector.load %arg2[%c0_1, %c0_2] : memref<128x32xf32, #tpu.memory_space<vmem>>, vector<128x32xf32>
    %cst = arith.constant dense<0.000000e+00> : vector<128x16xf32>
    %2 = tpu.matmul %1, %0, %cst {dimension_numbers = #tpu.dot_dimension_numbers<[1], [1], [0], [0], [0, 0, 1, 0], [], []>} : vector<128x32xf32>, vector<16x32xf32>, vector<128x16xf32> -> vector<128x16xf32>
    %c0_3 = arith.constant 0 : index
    %c0_4 = arith.constant 0 : index
    %3 = vector.load %arg3[%c0_3, %c0_4] : memref<128x1xf32, #tpu.memory_space<vmem>>, vector<128x1xf32>
    %4 = vector.broadcast %3 : vector<128x1xf32> to vector<128x16xf32>
    %5 = arith.subf %4, %2 : vector<128x16xf32>
    %cst_5 = arith.constant dense<0x7F800000> : vector<16xf32>
    %6 = vector.multi_reduction <minimumf>, %5, %cst_5 [0] : vector<128x16xf32> to vector<16xf32>
    %7 = vector.shape_cast %6 : vector<16xf32> to vector<1x16xf32>
    %8 = tpu.iota {dimensions = array<i32: 0>} : vector<128x16xi32>
    %c0_i32 = arith.constant 0 : i32
    %9 = vector.broadcast %c0_i32 : i32 to vector<128x16xi32>
    %10 = arith.addi %8, %9 : vector<128x16xi32>
    %11 = vector.broadcast %7 : vector<1x16xf32> to vector<128x16xf32>
    %12 = arith.cmpf oeq, %5, %11 : vector<128x16xf32>
    %c128_i32 = arith.constant 128 : i32
    %13 = vector.broadcast %c128_i32 : i32 to vector<128x16xi32>
    %14 = arith.select %12, %10, %13 : vector<128x16xi1>, vector<128x16xi32>
    %cst_6 = arith.constant dense<2147483647> : vector<16xi32>
    %15 = vector.multi_reduction <minsi>, %14, %cst_6 [0] : vector<128x16xi32> to vector<16xi32>
    %16 = vector.shape_cast %15 : vector<16xi32> to vector<1x16xi32>
    %17 = vector.shape_cast %16 : vector<1x16xi32> to vector<1x1x16xi32>
    %c0_7 = arith.constant 0 : index
    %c0_8 = arith.constant 0 : index
    %c0_9 = arith.constant 0 : index
    %18 = vector.load %arg6[%c0_7, %c0_8, %c0_9] : memref<1x1x16xi32, #tpu.memory_space<vmem>>, vector<1x1x16xi32>
    tpu.vector_store %arg6[%c0_7, %c0_8, %c0_9], %17 {strides = array<i32>} : memref<1x1x16xi32, #tpu.memory_space<vmem>>, vector<1x1x16xi32>,
    %19 = tpu.iota {dimensions = array<i32: 0>} : vector<128x16xi32>
    %c0_i32_10 = arith.constant 0 : i32
    %20 = vector.broadcast %c0_i32_10 : i32 to vector<128x16xi32>
    %21 = arith.addi %19, %20 : vector<128x16xi32>
    %22 = vector.broadcast %16 : vector<1x16xi32> to vector<128x16xi32>
    %23 = arith.cmpi eq, %21, %22 : vector<128x16xi32>
    %24 = arith.extui %23 : vector<128x16xi1> to vector<128x16xi32>
    %25 = arith.sitofp %24 : vector<128x16xi32> to vector<128x16xf32>
    %c0_11 = arith.constant 0 : index
    %c0_12 = arith.constant 0 : index
    %26 = vector.load %arg2[%c0_11, %c0_12] : memref<128x32xf32, #tpu.memory_space<vmem>>, vector<128x32xf32>
    %cst_13 = arith.constant dense<0.000000e+00> : vector<16x32xf32>
    %27 = tpu.matmul %25, %26, %cst_13 {dimension_numbers = #tpu.dot_dimension_numbers<[0], [0], [1], [1], [0, 1, 1, 1], [], []>} : vector<128x16xf32>, vector<128x32xf32>, vector<16x32xf32> -> vector<16x32xf32>
    %c0_14 = arith.constant 0 : index
    %c0_15 = arith.constant 0 : index
    %28 = vector.load %arg4[%c0_14, %c0_15] : memref<16x32xf32, #tpu.memory_space<vmem>>, vector<16x32xf32>
    tpu.vector_store %arg4[%c0_14, %c0_15], %27 {strides = array<i32>} : memref<16x32xf32, #tpu.memory_space<vmem>>, vector<16x32xf32>,
    %29 = arith.subf %27, %0 : vector<16x32xf32>
    %30 = arith.mulf %29, %29 : vector<16x32xf32>
    %31 = vector.shape_cast %30 : vector<16x32xf32> to vector<1x16x32xf32>
    %cst_16 = arith.constant dense<0.000000e+00> : vector<1xf32>
    %32 = vector.multi_reduction <add>, %31, %cst_16 [1, 2] : vector<1x16x32xf32> to vector<1xf32>
    %33 = vector.shape_cast %32 : vector<1xf32> to vector<1x1x1xf32>
    %34 = vector.extract %33[0, 0, 0] : f32 from vector<1x1x1xf32>
    %35 = vector.broadcast %34 : f32 to vector<1x1x1xf32>
    %c0_17 = arith.constant 0 : index
    %c0_18 = arith.constant 0 : index
    %c0_19 = arith.constant 0 : index
    %36 = vector.load %arg5[%c0_17, %c0_18, %c0_19] : memref<1x1x1xf32, #tpu.memory_space<vmem>>, vector<1x1x1xf32>
    tpu.vector_store %arg5[%c0_17, %c0_18, %c0_19], %35 {strides = array<i32>} : memref<1x1x1xf32, #tpu.memory_space<vmem>>, vector<1x1x1xf32>,
    return
  }
  func.func @transform_0(%arg0: i32) -> (i32, i32) {
    %c0_i32 = arith.constant 0 : i32
    %c0_i32_0 = arith.constant 0 : i32
    return %arg0, %c0_i32 : i32, i32
  }
  func.func @transform_1(%arg0: i32) -> (i32, i32) {
    %c0_i32 = arith.constant 0 : i32
    %c0_i32_0 = arith.constant 0 : i32
    %c0_i32_1 = arith.constant 0 : i32
    return %c0_i32, %c0_i32_0 : i32, i32
  }
  func.func @transform_2(%arg0: i32) -> (i32, i32) {
    %c0_i32 = arith.constant 0 : i32
    %c0_i32_0 = arith.constant 0 : i32
    %c0_i32_1 = arith.constant 0 : i32
    return %c0_i32, %c0_i32_0 : i32, i32
  }
  func.func @transform_3(%arg0: i32) -> (i32, i32) {
    %c0_i32 = arith.constant 0 : i32
    %c0_i32_0 = arith.constant 0 : i32
    return %arg0, %c0_i32 : i32, i32
  }
  func.func @transform_4(%arg0: i32) -> (i32, i32, i32) {
    %c0_i32 = arith.constant 0 : i32
    %c0_i32_0 = arith.constant 0 : i32
    %c0_i32_1 = arith.constant 0 : i32
    return %arg0, %c0_i32, %c0_i32_0 : i32, i32, i32
  }
  func.func @transform_5(%arg0: i32) -> (i32, i32, i32) {
    %c0_i32 = arith.constant 0 : i32
    %c0_i32_0 = arith.constant 0 : i32
    %c0_i32_1 = arith.constant 0 : i32
    return %arg0, %c0_i32, %c0_i32_0 : i32, i32, i32
  }
}

module attributes {stable_mosaic.version = 11 : i64} {
  func.func @_vq_kernel(%arg0: i32, %arg1: memref<16x32xf32, #tpu.memory_space<vmem>>, %arg2: memref<128x32xf32, #tpu.memory_space<vmem>>, %arg3: memref<128x1xf32, #tpu.memory_space<vmem>>, %arg4: memref<16x32xf32, #tpu.memory_space<vmem>>, %arg5: memref<1x1x1xf32, #tpu.memory_space<vmem>>, %arg6: memref<1x1x16xi32, #tpu.memory_space<vmem>>) attributes {dimension_semantics = [#tpu.dimension_semantics<parallel>], iteration_bounds = array<i64: 1>, scalar_prefetch = 0 : i64, scratch_operands = 0 : i64, tpu.core_type = #tpu.core_type<tc>, window_params = [{transform_indices = @transform_0, window_bounds = array<i64: 16, 32>}, {pipeline_mode = #tpu.pipeline_mode<synchronous>, transform_indices = @transform_1, window_bounds = array<i64: 128, 32>}, {pipeline_mode = #tpu.pipeline_mode<synchronous>, transform_indices = @transform_2, window_bounds = array<i64: 128, 1>}, {transform_indices = @transform_3, window_bounds = array<i64: 16, 32>}, {transform_indices = @transform_4, window_bounds = array<i64: 1, 1, 1>}, {transform_indices = @transform_5, window_bounds = array<i64: 1, 1, 16>}]} {
    %c0 = arith.constant 0 : index
    %c0_0 = arith.constant 0 : index
    %0 = vector.load %arg1[%c0, %c0_0] : memref<16x32xf32, #tpu.memory_space<vmem>>, vector<16x32xf32>
    %c0_1 = arith.constant 0 : index
    %c0_2 = arith.constant 0 : index
    %1 = vector.load %arg2[%c0_1, %c0_2] : memref<128x32xf32, #tpu.memory_space<vmem>>, vector<128x32xf32>
    %cst = arith.constant dense<0.000000e+00> : vector<128x16xf32>
    %2 = tpu.matmul %1, %0, %cst {dimension_numbers = #tpu.dot_dimension_numbers<[1], [1], [0], [0], [0, 0, 1, 0], [], []>} : vector<128x32xf32>, vector<16x32xf32>, vector<128x16xf32> -> vector<128x16xf32>
    %c0_3 = arith.constant 0 : index
    %c0_4 = arith.constant 0 : index
    %3 = vector.load %arg3[%c0_3, %c0_4] : memref<128x1xf32, #tpu.memory_space<vmem>>, vector<128x1xf32>
    %4 = vector.broadcast %3 : vector<128x1xf32> to vector<128x16xf32>
    %5 = arith.subf %4, %2 : vector<128x16xf32>
    %cst_5 = arith.constant dense<0x7F800000> : vector<16xf32>
    %6 = vector.multi_reduction <minimumf>, %5, %cst_5 [0] : vector<128x16xf32> to vector<16xf32>
    %7 = vector.shape_cast %6 : vector<16xf32> to vector<1x16xf32>
    %8 = tpu.iota {dimensions = array<i32: 0>} : vector<128x16xi32>
    %c0_i32 = arith.constant 0 : i32
    %9 = vector.broadcast %c0_i32 : i32 to vector<128x16xi32>
    %10 = arith.addi %8, %9 : vector<128x16xi32>
    %11 = vector.broadcast %7 : vector<1x16xf32> to vector<128x16xf32>
    %12 = arith.cmpf oeq, %5, %11 : vector<128x16xf32>
    %c128_i32 = arith.constant 128 : i32
    %13 = vector.broadcast %c128_i32 : i32 to vector<128x16xi32>
    %14 = arith.select %12, %10, %13 : vector<128x16xi1>, vector<128x16xi32>
    %cst_6 = arith.constant dense<2147483647> : vector<16xi32>
    %15 = vector.multi_reduction <minsi>, %14, %cst_6 [0] : vector<128x16xi32> to vector<16xi32>
    %16 = vector.shape_cast %15 : vector<16xi32> to vector<1x16xi32>
    %17 = vector.shape_cast %16 : vector<1x16xi32> to vector<1x1x16xi32>
    %c0_7 = arith.constant 0 : index
    %c0_8 = arith.constant 0 : index
    %c0_9 = arith.constant 0 : index
    %18 = vector.load %arg6[%c0_7, %c0_8, %c0_9] : memref<1x1x16xi32, #tpu.memory_space<vmem>>, vector<1x1x16xi32>
    tpu.vector_store %arg6[%c0_7, %c0_8, %c0_9], %17 {strides = array<i32>} : memref<1x1x16xi32, #tpu.memory_space<vmem>>, vector<1x1x16xi32>,
    %19 = tpu.iota {dimensions = array<i32: 0>} : vector<128x16xi32>
    %c0_i32_10 = arith.constant 0 : i32
    %20 = vector.broadcast %c0_i32_10 : i32 to vector<128x16xi32>
    %21 = arith.addi %19, %20 : vector<128x16xi32>
    %22 = vector.broadcast %16 : vector<1x16xi32> to vector<128x16xi32>
    %23 = arith.cmpi eq, %21, %22 : vector<128x16xi32>
    %24 = arith.extui %23 : vector<128x16xi1> to vector<128x16xi32>
    %25 = arith.sitofp %24 : vector<128x16xi32> to vector<128x16xf32>
    %c0_11 = arith.constant 0 : index
    %c0_12 = arith.constant 0 : index
    %26 = vector.load %arg2[%c0_11, %c0_12] : memref<128x32xf32, #tpu.memory_space<vmem>>, vector<128x32xf32>
    %cst_13 = arith.constant dense<0.000000e+00> : vector<16x32xf32>
    %27 = tpu.matmul %25, %26, %cst_13 {dimension_numbers = #tpu.dot_dimension_numbers<[0], [0], [1], [1], [0, 1, 1, 1], [], []>} : vector<128x16xf32>, vector<128x32xf32>, vector<16x32xf32> -> vector<16x32xf32>
    %c0_14 = arith.constant 0 : index
    %c0_15 = arith.constant 0 : index
    %28 = vector.load %arg4[%c0_14, %c0_15] : memref<16x32xf32, #tpu.memory_space<vmem>>, vector<16x32xf32>
    tpu.vector_store %arg4[%c0_14, %c0_15], %27 {strides = array<i32>} : memref<16x32xf32, #tpu.memory_space<vmem>>, vector<16x32xf32>,
    %29 = arith.subf %27, %0 : vector<16x32xf32>
    %30 = arith.mulf %29, %29 : vector<16x32xf32>
    %31 = vector.shape_cast %30 : vector<16x32xf32> to vector<1x16x32xf32>
    %cst_16 = arith.constant dense<0.000000e+00> : vector<1xf32>
    %32 = vector.multi_reduction <add>, %31, %cst_16 [1, 2] : vector<1x16x32xf32> to vector<1xf32>
    %33 = vector.shape_cast %32 : vector<1xf32> to vector<1x1x1xf32>
    %34 = vector.extract %33[0, 0, 0] : f32 from vector<1x1x1xf32>
    %35 = vector.broadcast %34 : f32 to vector<1x1x1xf32>
    %c0_17 = arith.constant 0 : index
    %c0_18 = arith.constant 0 : index
    %c0_19 = arith.constant 0 : index
    %36 = vector.load %arg5[%c0_17, %c0_18, %c0_19] : memref<1x1x1xf32, #tpu.memory_space<vmem>>, vector<1x1x1xf32>
    tpu.vector_store %arg5[%c0_17, %c0_18, %c0_19], %35 {strides = array<i32>} : memref<1x1x1xf32, #tpu.memory_space<vmem>>, vector<1x1x1xf32>,
    return
  }
  func.func @transform_0(%arg0: i32) -> (i32, i32) {
    %c0_i32 = arith.constant 0 : i32
    %c0_i32_0 = arith.constant 0 : i32
    return %arg0, %c0_i32 : i32, i32
  }
  func.func @transform_1(%arg0: i32) -> (i32, i32) {
    %c0_i32 = arith.constant 0 : i32
    %c0_i32_0 = arith.constant 0 : i32
    %c0_i32_1 = arith.constant 0 : i32
    return %c0_i32, %c0_i32_0 : i32, i32
  }
  func.func @transform_2(%arg0: i32) -> (i32, i32) {
    %c0_i32 = arith.constant 0 : i32
    %c0_i32_0 = arith.constant 0 : i32
    %c0_i32_1 = arith.constant 0 : i32
    return %c0_i32, %c0_i32_0 : i32, i32
  }
  func.func @transform_3(%arg0: i32) -> (i32, i32) {
    %c0_i32 = arith.constant 0 : i32
    %c0_i32_0 = arith.constant 0 : i32
    return %arg0, %c0_i32 : i32, i32
  }
  func.func @transform_4(%arg0: i32) -> (i32, i32, i32) {
    %c0_i32 = arith.constant 0 : i32
    %c0_i32_0 = arith.constant 0 : i32
    %c0_i32_1 = arith.constant 0 : i32
    return %arg0, %c0_i32, %c0_i32_0 : i32, i32, i32
  }
  func.func @transform_5(%arg0: i32) -> (i32, i32, i32) {
    %c0_i32 = arith.constant 0 : i32
    %c0_i32_0 = arith.constant 0 : i32
    %c0_i32_1 = arith.constant 0 : i32
    return %arg0, %c0_i32, %c0_i32_0 : i32, i32, i32
  }
}

</mosaic_0001>

<bundles_post_ra>
// kernel: tpu_custom_call.1
= control target key start
LH: loop header
LB: loop body
LE: loop exit
PB: predicated region body
PF: predicated region fallthrough
CT: control target
= control target key end

     0   :  { %11 = vsyncpa [#allocation3], 0  ;;  %vm1140_vm0 = vcmask 261120   ;;  %v731_v2 = vmov 0   ;;  %s1134_s0 = inlined_call_operand.vmem [shape: f32[16,32], index: 0, kind: input, shape index: {}]   ;;  %s1135_s1 = inlined_call_operand.vmem [shape: f32[128,32], index: 1, kind: input, shape index: {}]   ;;  %s1136_s2 = inlined_call_operand.vmem [shape: f32[128,1], index: 2, kind: input, shape index: {}]   ;;  %s1137_s3 = inlined_call_operand.hbm [shape: f32[16,32], index: 3, kind: output, shape index: {0}]   ;;  %s1138_s4 = inlined_call_operand.hbm [shape: f32[1,1,1], index: 4, kind: output, shape index: {1}]   ;;  %s1139_s5 = inlined_call_operand.hbm [shape: s32[1,1,16], index: 5, kind: output, shape index: {2}]  }
   0x1   :  { %v771_v0 = vld [vmem:[%s1134_s0 + $0x8] sm:$0xff]  ;;  %v157_v1 = vld [vmem:[%s1136_s2] sm:$0xff]  ;;  %652 = vset.pattern.permute.xlu0 %v731_v2  ;;  %v159_v3 = vld [vmem:[%s1136_s2 + $0x10] sm:$0xff]  ;;  %653 = vset.pattern.permute.xlu1 %v731_v2 }
   0x2   :  { %602 = vmatpush.xpose.msk.msra.mxu0 %vm1140_vm0, %v771_v0  ;;  %636 = vmatpush.xpose.msk.msra.mxu2 %vm1140_vm0, %v771_v0  ;;  %v788_v4 = vld [vmem:[%s1134_s0] sm:$0xff]  ;;  %v26_v6 = vld [vmem:[%s1135_s1 + $0x28] sm:$0xff]  ;;  %v32_v7 = vld [vmem:[%s1135_s1 + $0x58] sm:$0xff] }
   0x3   :  { %637 = vmatpush.xpose.msk.msra.mxu3 %vm1140_vm0, %v771_v0  ;;  %175 = vperm.xlu0 %652, %v157_v1   ;;  %v795_v5 = vld [vmem:[%s1135_s1] sm:$0xff]  ;;  %v158_v9 = vld [vmem:[%s1136_s2 + $0x8] sm:$0xff]  ;;  %v160_v10 = vld [vmem:[%s1136_s2 + $0x18] sm:$0xff] }
   0x4   :  { %185 = vperm.xlu1 %653, %v159_v3   ;;  %654 = vset.pattern.permute.xlu2 %v731_v2  ;;  %v161_v8 = vld [vmem:[%s1136_s2 + $0x20] sm:$0xff]  ;;  %v823_v11 = vld [vmem:[%s1135_s1 + $0x78] sm:$0xff] }
   0x5   :  { %195 = vperm.xlu2 %654, %v161_v8   ;;  %509 = vmatpush.msra.mxu1 %v823_v11 }
   0x6   :  { %603 = vmatpush.xpose.msk.msra.mxu0 %vm1140_vm0, %v788_v4  ;;  %638 = vmatpush.xpose.msk.msra.mxu2 %vm1140_vm0, %v788_v4 }
   0x7   :  { %639 = vmatpush.xpose.msk.msra.mxu3 %vm1140_vm0, %v788_v4 }
   0x9   :  { %604 = vmatmul.msk.f32.vlgmr.msra.gmra.mxu0 %vm1140_vm0, %v795_v5  ;;  %609 = vmatmul.msk.f32.vlgmr.msra.gmra.mxu2 %vm1140_vm0, %v26_v6 }
   0xa   :  { %615 = vmatmul.msk.f32.vlgmr.msra.gmra.mxu3 %vm1140_vm0, %v32_v7 }
   0xb   :  { %12 = vsyncpa [#allocation5], 0  ;;  %180 = vperm.xlu0 %652, %v158_v9   ;;  %v35_v12 = vld [vmem:[%s1135_s1 + $0x70] sm:$0xff]  ;;  %v162_v13 = vld [vmem:[%s1136_s2 + $0x28] sm:$0xff]  ;;  %vm1141_vm1 = vcmask 130048   ;;  %s559_s10 = sshll.u32 %s1137_s3, 4  ;;  %s560_s10 = int_to_ptr.hbm [resolvable:$true] %s559_s10 }
   0xc   :  { %190 = vperm.xlu1 %653, %v160_v10   ;;  %510 = vmatpush.msra.mxu1 %v35_v12  ;;  %v22_v14 = vld [vmem:[%s1135_s1 + $0x8] sm:$0xff]  ;;  %v27_v16 = vld [vmem:[%s1135_s1 + $0x30] sm:$0xff]  ;;  %v33_v17 = vld [vmem:[%s1135_s1 + $0x60] sm:$0xff]  ;;  %s734_s11 = smov 128   ;;  %s735_s12 = smov 8  }
   0xd   :  { %v34_v15 = vld [vmem:[%s1135_s1 + $0x68] sm:$0xff]  ;;  %200 = vperm.xlu2 %654, %v162_v13   ;;  %v163_v18 = vld [vmem:[%s1136_s2 + $0x30] sm:$0xff]  ;;  %v164_v19 = vld [vmem:[%s1136_s2 + $0x38] sm:$0xff]  ;;  %s573_s15 = sshll.u32 %s1138_s4, 4  ;;  %s736_s16 = smov [#allocation4]   ;;  %s574_s15 = int_to_ptr.hbm [resolvable:$true] %s573_s15 }
   0xe   :  { %511 = vmatpush.msra.mxu1 %v34_v15  ;;  %v31_v20 = vld [vmem:[%s1135_s1 + $0x50] sm:$0xff]  ;;  %v165_v21 = vld [vmem:[%s1136_s2 + $0x40] sm:$0xff]  ;;  %v30_v23 = vld [vmem:[%s1135_s1 + $0x48] sm:$0xff]  ;;  %s571_s17 = sshll.u32 %s736_s16, 4  ;;  %s737_s3 = smov [#allocation6]   ;;  %s572_s17 = int_to_ptr.vmem [resolvable:$true] %s571_s17 }
   0xf   :  { %v23_v22 = vld [vmem:[%s1135_s1 + $0x10] sm:$0xff]  ;;  %v28_v24 = vld [vmem:[%s1135_s1 + $0x38] sm:$0xff]  ;;  %v29_v25 = vld [vmem:[%s1135_s1 + $0x40] sm:$0xff]  ;;  %s582_s18 = sshll.u32 %s737_s3, 4  ;;  %s584_s21 = sshll.u32 %s1139_s5, 4  ;;  %s583_s18 = int_to_ptr.vmem [resolvable:$true] %s582_s18  ;;  %s585_s21 = int_to_ptr.hbm [resolvable:$true] %s584_s21 }
  0x10   :  { %512 = vmatpush.msra.mxu1 %v33_v17  ;;  %v166_v26 = vld [vmem:[%s1136_s2 + $0x48] sm:$0xff]  ;;  %v167_v27 = vld [vmem:[%s1136_s2 + $0x50] sm:$0xff]  ;;  %v168_v28 = vld [vmem:[%s1136_s2 + $0x58] sm:$0xff] }
  0x11   :  { %605 = vmatmul.msk.f32.gmra.mxu0 %vm1140_vm0, %v22_v14  ;;  %610 = vmatmul.msk.f32.gmra.mxu2 %vm1140_vm0, %v27_v16  ;;  %v24_v29 = vld [vmem:[%s1135_s1 + $0x18] sm:$0xff]  ;;  %v25_v30 = vld [vmem:[%s1135_s1 + $0x20] sm:$0xff]  ;;  %v170_v32 = vld [vmem:[%s1136_s2 + $0x68] sm:$0xff] }
  0x12   :  { %616 = vmatmul.msk.f32.gmra.mxu3 %vm1140_vm0, %v33_v17  ;;  %513 = vmatpush.msra.mxu1 %v32_v7  ;;  %v169_v31 = vld [vmem:[%s1136_s2 + $0x60] sm:$0xff]  ;;  %v171_v33 = vld [vmem:[%s1136_s2 + $0x70] sm:$0xff]  ;;  %v172_v34 = vld [vmem:[%s1136_s2 + $0x78] sm:$0xff]  ;;  %s733_s2 = smov [#allocation2]  }
  0x13   :  { %205 = vperm.xlu0 %652, %v163_v18   ;;  %s557_s7 = sshll.u32 %s733_s2, 4  ;;  %s558_s7 = int_to_ptr.vmem [resolvable:$true] %s557_s7 }
  0x14   :  { %210 = vperm.xlu1 %653, %v164_v19   ;;  %514 = vmatpush.msra.mxu1 %v31_v20 }
  0x15   :  { %215 = vperm.xlu2 %654, %v165_v21  }
  0x16   :  { %515 = vmatpush.msra.mxu1 %v30_v23 }
  0x18   :  { %516 = vmatpush.msra.mxu1 %v29_v25 }
  0x19   :  { %606 = vmatmul.msk.f32.gmra.mxu0 %vm1140_vm0, %v23_v22  ;;  %611 = vmatmul.msk.f32.gmra.mxu2 %vm1140_vm0, %v28_v24 }
  0x1a   :  { %617 = vmatmul.msk.f32.gmra.mxu3 %vm1140_vm0, %v34_v15  ;;  %517 = vmatpush.msra.mxu1 %v28_v24 }
  0x1b   :  { %220 = vperm.xlu0 %652, %v166_v26  }
  0x1c   :  { %225 = vperm.xlu1 %653, %v167_v27   ;;  %518 = vmatpush.msra.mxu1 %v27_v16 }
  0x1d   :  { %230 = vperm.xlu2 %654, %v168_v28  }
  0x1e   :  { %519 = vmatpush.msra.mxu1 %v26_v6 }
  0x20   :  { %520 = vmatpush.msra.mxu1 %v25_v30 }
  0x21   :  { %607 = vmatmul.msk.f32.gmra.mxu0 %vm1140_vm0, %v24_v29  ;;  %612 = vmatmul.msk.f32.gmra.mxu2 %vm1140_vm0, %v29_v25 }
  0x22   :  { %618 = vmatmul.msk.f32.gmra.mxu3 %vm1140_vm0, %v35_v12  ;;  %521 = vmatpush.msra.mxu1 %v24_v29 }
  0x23   :  { %235 = vperm.xlu0 %652, %v169_v31  }
  0x24   :  { %240 = vperm.xlu1 %653, %v170_v32   ;;  %522 = vmatpush.msra.mxu1 %v23_v22 }
  0x25   :  { %245 = vperm.xlu2 %654, %v171_v33  }
  0x26   :  { %523 = vmatpush.msra.mxu1 %v22_v14 }
  0x28   :  { %524 = vmatpush.msra.mxu1 %v795_v5 }
  0x29   :  { %608 = vmatmul.msk.f32.gmra.mxu0 %vm1140_vm0, %v25_v30  ;;  %613 = vmatmul.msk.f32.gmra.mxu2 %vm1140_vm0, %v30_v23 }
  0x2a   :  { %619 = vmatmul.msk.f32.gmra.mxu3 %vm1140_vm0, %v823_v11 }
  0x2b   :  { %250 = vperm.xlu0 %652, %v172_v34  }
  0x31   :  { %614 = vmatmul.msk.f32.gmra.mxu2 %vm1140_vm0, %v31_v20 }
  0x5f   :  { %v196_v39 = vpop.permute.xlu2 %195 }
  0x67   :  { %v201_v48 = vpop.permute.xlu2 %200 }
  0x6f   :  { %v216_v54 = vpop.permute.xlu2 %215 }
  0x75   :  { %v176_v35 = vpop.permute.xlu0 %175 }
  0x76   :  { %v186_v37 = vpop.permute.xlu1 %185 }
  0x77   :  { %v231_v60 = vpop.permute.xlu2 %230 }
  0x7d   :  { %v181_v38 = vpop.permute.xlu0 %180 }
  0x7e   :  { %v191_v43 = vpop.permute.xlu1 %190 }
  0x7f   :  { %v246_v27 = vpop.permute.xlu2 %245 }
  0x85   :  { %v206_v44 = vpop.permute.xlu0 %205 }
  0x86   :  { %v109_v36 = vpop.f32.mrf.mxu0  ;;  %v211_v51 = vpop.permute.xlu1 %210 }
  0x87   :  { %v914_v63 = vsub.f32 %v176_v35, %v109_v36 }
  0x89   :  { %v270_v10 = vsel %vm1141_vm1, %v914_v63, inf }
  0x8c   :  { %v124_v40 = vpop.f32.mrf.mxu2 }
  0x8d   :  { %v142_v41 = vpop.f32.mrf.mxu3  ;;  %v221_v52 = vpop.permute.xlu0 %220  ;;  %v916_v1 = vsub.f32 %v201_v48, %v124_v40 }
  0x8e   :  { %v112_v42 = vpop.f32.mrf.mxu0  ;;  %v226_v57 = vpop.permute.xlu1 %225  ;;  %v942_v17 = vsub.f32 %v231_v60, %v142_v41 }
  0x8f   :  { %v910_v61 = vsub.f32 %v181_v38, %v112_v42  ;;  %v276_v11 = vsel %vm1141_vm1, %v916_v1, inf }
  0x91   :  { %v271_v6 = vsel %vm1141_vm1, %v910_v61, inf }
  0x92   :  { %v277_v18 = vmin.f32 %v271_v6, %v276_v11 }
  0x94   :  { %v127_v45 = vpop.f32.mrf.mxu2 }
  0x95   :  { %v145_v46 = vpop.f32.mrf.mxu3  ;;  %v236_v58 = vpop.permute.xlu0 %235  ;;  %v934_v13 = vsub.f32 %v206_v44, %v127_v45 }
  0x96   :  { %v115_v47 = vpop.f32.mrf.mxu0  ;;  %v241_v19 = vpop.permute.xlu1 %240  ;;  %v952_v26 = vsub.f32 %v236_v58, %v145_v46 }
  0x97   :  { %v924_v7 = vsub.f32 %v186_v37, %v115_v47  ;;  %v278_v31 = vsel %vm1141_vm1, %v934_v13, inf  ;;  %v288_v37 = vsel %vm1141_vm1, %v942_v17, inf }
  0x98   :  { %v290_v44 = vsel %vm1141_vm1, %v952_v26, inf }
  0x99   :  { %v272_v22 = vsel %vm1141_vm1, %v924_v7, inf }
  0x9a   :  { %v279_v35 = vmin.f32 %v272_v22, %v278_v31 }
  0x9c   :  { %v130_v49 = vpop.f32.mrf.mxu2 }
  0x9d   :  { %v148_v50 = vpop.f32.mrf.mxu3  ;;  %v926_v8 = vsub.f32 %v211_v51, %v130_v49  ;;  %v251_v20 = vpop.permute.xlu0 %250 }
  0x9e   :  { %v118_v53 = vpop.f32.mrf.mxu0  ;;  %v948_v24 = vsub.f32 %v241_v19, %v148_v50 }
  0x9f   :  { %v918_v3 = vsub.f32 %v191_v43, %v118_v53  ;;  %v280_v23 = vsel %vm1141_vm1, %v926_v8, inf }
  0xa0   :  { %v292_v38 = vsel %vm1141_vm1, %v948_v24, inf }
  0xa1   :  { %v273_v14 = vsel %vm1141_vm1, %v918_v3, inf }
  0xa2   :  { %v281_v28 = vmin.f32 %v273_v14, %v280_v23 }
  0xa4   :  { %v133_v55 = vpop.f32.mrf.mxu2  ;;  %v289_v42 = vmin.f32 %v281_v28, %v288_v37 }
  0xa5   :  { %v151_v56 = vpop.f32.mrf.mxu3  ;;  %v938_v15 = vsub.f32 %v216_v54, %v133_v55 }
  0xa6   :  { %v121_v59 = vpop.f32.mrf.mxu0  ;;  %v958_v33 = vsub.f32 %v246_v27, %v151_v56 }
  0xa7   :  { %v912_v62 = vsub.f32 %v196_v39, %v121_v59  ;;  %v282_v32 = vsel %vm1141_vm1, %v938_v15, inf }
  0xa8   :  { %v294_v45 = vsel %vm1141_vm1, %v958_v33, inf }
  0xa9   :  { %v274_v9 = vsel %vm1141_vm1, %v912_v62, inf }
  0xaa   :  { %v275_v21 = vmin.f32 %v270_v10, %v274_v9 }
  0xac   :  { %v136_v2 = vpop.f32.mrf.mxu2  ;;  %v283_v36 = vmin.f32 %v275_v21, %v282_v32 }
  0xad   :  { %v920_v5 = vsub.f32 %v221_v52, %v136_v2  ;;  %v154_v12 = vpop.f32.mrf.mxu3  ;;  %v307_v52 = vlaneseq }
  0xae   :  { %v950_v25 = vsub.f32 %v251_v20, %v154_v12  ;;  %v291_v46 = vmin.f32 %v283_v36, %v290_v44 }
  0xaf   :  { %v284_v16 = vsel %vm1141_vm1, %v920_v5, inf  ;;  %v974_v55 = vshrl.u32 %v307_v52, 7 }
  0xb0   :  { %v285_v29 = vmin.f32 %v277_v18, %v284_v16  ;;  %v296_v39 = vsel %vm1141_vm1, %v950_v25, inf }
  0xb1   :  { %v297_v47 = vmin.f32 %v289_v42, %v296_v39  ;;  %v977_v58 = vadd.s32 8, %v974_v55  ;;  %v980_v60 = vadd.s32 16, %v974_v55  ;;  %v983_v2 = vadd.s32 24, %v974_v55 }
  0xb2   :  { %v293_v41 = vmin.f32 %v285_v29, %v292_v38  ;;  %v986_v6 = vadd.s32 32, %v974_v55  ;;  %v989_v9 = vadd.s32 40, %v974_v55  ;;  %v992_v10 = vadd.s32 48, %v974_v55 }
  0xb3   :  { %v995_v11 = vadd.s32 56, %v974_v55  ;;  %v998_v12 = vadd.s32 64, %v974_v55  ;;  %v1001_v16 = vadd.s32 72, %v974_v55  ;;  %v1004_v18 = vadd.s32 80, %v974_v55 }
  0xb4   :  { %v139_v30 = vpop.f32.mrf.mxu2  ;;  %v298_v49 = vmin.f32 %v291_v46, %v293_v41  ;;  %v1007_v19 = vadd.s32 88, %v974_v55  ;;  %v1010_v20 = vadd.s32 96, %v974_v55  ;;  %v1013_v21 = vadd.s32 104, %v974_v55 }
  0xb5   :  { %v960_v34 = vsub.f32 %v226_v57, %v139_v30  ;;  %v1016_v22 = vadd.s32 112, %v974_v55  ;;  %v1019_v23 = vadd.s32 120, %v974_v55 }
  0xb7   :  { %v286_v40 = vsel %vm1141_vm1, %v960_v34, inf }
  0xb8   :  { %v287_v43 = vmin.f32 %v279_v35, %v286_v40 }
  0xba   :  { %v295_v48 = vmin.f32 %v287_v43, %v294_v45 }
  0xbc   :  { %v299_v50 = vmin.f32 %v295_v48, %v297_v47 }
  0xbe   :  { %v300_v51 = vmin.f32 %v298_v49, %v299_v50 }
  0xc0   :  { %v301_v53 = vrot.slane %v300_v51, 4 }
  0xc2   :  { %v302_v54 = vmin.f32 %v300_v51, %v301_v53 }
  0xc4   :  { %v303_v56 = vrot.slane %v302_v54, 2 }
  0xc6   :  { %v304_v57 = vmin.f32 %v302_v54, %v303_v56 }
  0xc8   :  { %v305_v59 = vrot.slane %v304_v57, 1 }
  0xca   :  { %v306_v14 = vmin.f32 %v304_v57, %v305_v59 }
  0xcc   :  { %vm324_vm2 = vcmp.eq.f32.partialorder %v914_v63, %v306_v14  ;;  %vm325_vm3 = vcmp.eq.f32.partialorder %v910_v61, %v306_v14  ;;  %vm326_vm4 = vcmp.eq.f32.partialorder %v924_v7, %v306_v14  ;;  %vm327_vm5 = vcmp.eq.f32.partialorder %v918_v3, %v306_v14 }
  0xcd   :  { %vm328_vm6 = vcmp.eq.f32.partialorder %v912_v62, %v306_v14  ;;  %vm329_vm7 = vcmp.eq.f32.partialorder %v916_v1, %v306_v14  ;;  %vm330_vm8 = vcmp.eq.f32.partialorder %v934_v13, %v306_v14  ;;  %vm331_vm9 = vcmp.eq.f32.partialorder %v926_v8, %v306_v14 }
  0xce   :  { %vm332_vm10 = vcmp.eq.f32.partialorder %v938_v15, %v306_v14  ;;  %vm333_vm11 = vcmp.eq.f32.partialorder %v920_v5, %v306_v14  ;;  %vm334_vm12 = vcmp.eq.f32.partialorder %v960_v34, %v306_v14  ;;  %vm335_vm13 = vcmp.eq.f32.partialorder %v942_v17, %v306_v14 }
  0xcf   :  { %vm336_vm14 = vcmp.eq.f32.partialorder %v952_v26, %v306_v14  ;;  %vm337_vm15 = vcmp.eq.f32.partialorder %v948_v24, %v306_v14  ;;  %vm338_vm0 = vcmp.eq.f32.partialorder %v958_v33, %v306_v14  ;;  %vm339_vm1 = vcmp.eq.f32.partialorder %v950_v25, %v306_v14 }
  0xd0   :  { %v340_v27 = vsel %vm324_vm2, %v974_v55, 128  ;;  %v341_v28 = vsel %vm325_vm3, %v977_v58, 128  ;;  %v342_v29 = vsel %vm326_vm4, %v980_v60, 128  ;;  %v343_v30 = vsel %vm327_vm5, %v983_v2, 128 }
  0xd1   :  { %v344_v31 = vsel %vm328_vm6, %v986_v6, 128  ;;  %v345_v63 = vsel %vm329_vm7, %v989_v9, 128  ;;  %v346_v61 = vsel %vm330_vm8, %v992_v10, 128  ;;  %v347_v7 = vsel %vm331_vm9, %v995_v11, 128 }
  0xd2   :  { %v348_v3 = vsel %vm332_vm10, %v998_v12, 128  ;;  %v349_v62 = vsel %vm333_vm11, %v1001_v16, 128  ;;  %v350_v1 = vsel %vm334_vm12, %v1004_v18, 128  ;;  %v351_v13 = vsel %vm335_vm13, %v1007_v19, 128 }
  0xd3   :  { %v352_v8 = vsel %vm336_vm14, %v1010_v20, 128  ;;  %v353_v15 = vsel %vm337_vm15, %v1013_v21, 128  ;;  %v354_v5 = vsel %vm338_vm0, %v1016_v22, 128  ;;  %v355_v32 = vsel %vm339_vm1, %v1019_v23, 128 }
  0xd4   :  { %vm1142_vm2 = vcmask 130048  }
  0xd5   :  { %v356_v34 = vsel %vm1142_vm2, %v340_v27, 2147483647  ;;  %vm1143_vm3 = vmmov %vm1142_vm2 }
  0xd6   :  { %v357_v17 = vsel %vm1143_vm3, %v341_v28, 2147483647  ;;  %vm1144_vm4 = vmmov %vm1142_vm2 }
  0xd7   :  { %v358_v35 = vsel %vm1144_vm4, %v342_v29, 2147483647  ;;  %vm1145_vm5 = vmmov %vm1142_vm2 }
  0xd8   :  { %v359_v26 = vsel %vm1145_vm5, %v343_v30, 2147483647  ;;  %vm1146_vm6 = vmmov %vm1142_vm2 }
  0xd9   :  { %v360_v36 = vsel %vm1146_vm6, %v344_v31, 2147483647  ;;  %vm1147_vm7 = vmmov %vm1142_vm2 }
  0xda   :  { %v363_v24 = vsel %vm1147_vm7, %v345_v63, 2147483647  ;;  %vm361_vm8 = vcmp.lt.s32.totalorder %v356_v34, %v360_v36  ;;  %vm1148_vm10 = vmmov %vm1142_vm2 }
  0xdb   :  { %vm364_vm9 = vcmp.lt.s32.totalorder %v357_v17, %v363_v24  ;;  %v366_v33 = vsel %vm1148_vm10, %v346_v61, 2147483647  ;;  %vm1149_vm0 = vmmov %vm1142_vm2  ;;  %v362_v25 = vsel %vm361_vm8, %v356_v34, %v360_v36 }
  0xdc   :  { %v369_v37 = vsel %vm1149_vm0, %v347_v7, 2147483647  ;;  %v365_v38 = vsel %vm364_vm9, %v357_v17, %v363_v24  ;;  %vm367_vm1 = vcmp.lt.s32.totalorder %v358_v35, %v366_v33  ;;  %vm1150_vm12 = vmmov %vm1149_vm0  ;;  %v393_v52 = vsel %vm1149_vm0, %v355_v32, 2147483647 }
  0xdd   :  { %vm370_vm11 = vcmp.lt.s32.totalorder %v359_v26, %v369_v37  ;;  %v368_v39 = vsel %vm367_vm1, %v358_v35, %v366_v33  ;;  %v372_v41 = vsel %vm1150_vm12, %v348_v3, 2147483647  ;;  %vm1151_vm13 = vmmov %vm1149_vm0  ;;  %v732_v7 = vmov 0.0  }
  0xde   :  { %v371_v40 = vsel %vm370_vm11, %v359_v26, %v369_v37  ;;  %v375_v42 = vsel %vm1151_vm13, %v349_v62, 2147483647  ;;  %vm373_vm14 = vcmp.lt.s32.totalorder %v362_v25, %v372_v41  ;;  %vm1152_vm2 = vmmov %vm1149_vm0 }
  0xdf   :  { %vm376_vm15 = vcmp.lt.s32.totalorder %v365_v38, %v375_v42  ;;  %v378_v43 = vsel %vm1152_vm2, %v350_v1, 2147483647  ;;  %vm1153_vm3 = vmmov %vm1149_vm0  ;;  %v374_v45 = vsel %vm373_vm14, %v362_v25, %v372_v41 }
  0xe0   :  { %v381_v44 = vsel %vm1153_vm3, %v351_v13, 2147483647  ;;  %v377_v46 = vsel %vm376_vm15, %v365_v38, %v375_v42  ;;  %vm379_vm4 = vcmp.lt.s32.totalorder %v368_v39, %v378_v43  ;;  %vm1154_vm6 = vmmov %vm1149_vm0  ;;  %vm411_vm3 = vcmask 122880  }
  0xe1   :  { %vm382_vm5 = vcmp.lt.s32.totalorder %v371_v40, %v381_v44  ;;  %v380_v47 = vsel %vm379_vm4, %v368_v39, %v378_v43  ;;  %v384_v49 = vsel %vm1154_vm6, %v352_v8, 2147483647  ;;  %vm1155_vm7 = vmmov %vm1149_vm0 }
  0xe2   :  { %v383_v48 = vsel %vm382_vm5, %v371_v40, %v381_v44  ;;  %v387_v50 = vsel %vm1155_vm7, %v353_v15, 2147483647  ;;  %vm385_vm8 = vcmp.lt.s32.totalorder %v374_v45, %v384_v49  ;;  %vm1156_vm10 = vmmov %vm1149_vm0 }
  0xe3   :  { %vm388_vm9 = vcmp.lt.s32.totalorder %v377_v46, %v387_v50  ;;  %v390_v51 = vsel %vm1156_vm10, %v354_v5, 2147483647  ;;  %v386_v53 = vsel %vm385_vm8, %v374_v45, %v384_v49  ;;  %vm394_vm11 = vcmp.lt.s32.totalorder %v383_v48, %v393_v52 }
  0xe4   :  { %v389_v54 = vsel %vm388_vm9, %v377_v46, %v387_v50  ;;  %vm391_vm1 = vcmp.lt.s32.totalorder %v380_v47, %v390_v51  ;;  %v395_v57 = vsel %vm394_vm11, %v383_v48, %v393_v52 }
  0xe5   :  { %v392_v56 = vsel %vm391_vm1, %v380_v47, %v390_v51  ;;  %vm396_vm12 = vcmp.lt.s32.totalorder %v386_v53, %v389_v54 }
  0xe6   :  { %v397_v59 = vsel %vm396_vm12, %v386_v53, %v389_v54  ;;  %vm398_vm13 = vcmp.lt.s32.totalorder %v392_v56, %v395_v57 }
  0xe7   :  { %v399_v14 = vsel %vm398_vm13, %v392_v56, %v395_v57 }
  0xe8   :  { %vm400_vm14 = vcmp.lt.s32.totalorder %v397_v59, %v399_v14 }
  0xe9   :  { %v401_v27 = vsel %vm400_vm14, %v397_v59, %v399_v14 }
  0xea   :  { %v402_v28 = vrot.slane %v401_v27, 4 }
  0xec   :  { %vm403_vm15 = vcmp.lt.s32.totalorder %v401_v27, %v402_v28 }
  0xed   :  { %v404_v29 = vsel %vm403_vm15, %v401_v27, %v402_v28 }
  0xee   :  { %v405_v30 = vrot.slane %v404_v29, 2 }
  0xf0   :  { %vm406_vm2 = vcmp.lt.s32.totalorder %v404_v29, %v405_v30 }
  0xf1   :  { %v407_v31 = vsel %vm406_vm2, %v404_v29, %v405_v30 }
  0xf2   :  { %v408_v63 = vrot.slane %v407_v31, 1 }
  0xf4   :  { %vm409_vm4 = vcmp.lt.s32.totalorder %v407_v31, %v408_v63 }
  0xf5   :  { %v410_v61 = vsel %vm409_vm4, %v407_v31, %v408_v63 }
  0xf6   :  { %vm413_vm5 = vcmp.eq.s32.totalorder %v974_v55, %v410_v61  ;;  %412 = vst.msk [vmem:[#allocation6] sm:$0x1] %vm411_vm3, %v410_v61  ;;  %vm414_vm6 = vcmp.eq.s32.totalorder %v977_v58, %v410_v61  ;;  %vm421_vm7 = vcmp.eq.s32.totalorder %v998_v12, %v410_v61  ;;  %vm422_vm8 = vcmp.eq.s32.totalorder %v1001_v16, %v410_v61 }
  0xf7   :  { %v620_v3 = vsel %vm413_vm5, 1.0, %v732_v7  ;;  %vm423_vm9 = vcmp.eq.s32.totalorder %v1004_v18, %v410_v61  ;;  %vm424_vm10 = vcmp.eq.s32.totalorder %v1007_v19, %v410_v61  ;;  %v628_v62 = vsel %vm421_vm7, 1.0, %v732_v7 }
  0xf8   :  { %477 = vxpose.xlu1.b32.start [1/16] (narrow) %v620_v3, 16  ;;  %v629_v1 = vsel %vm422_vm8, 1.0, %v732_v7  ;;  %v630_v13 = vsel %vm423_vm9, 1.0, %v732_v7  ;;  %v631_v8 = vsel %vm424_vm10, 1.0, %v732_v7  ;;  %vm425_vm0 = vcmp.eq.s32.totalorder %v1010_v20, %v410_v61 }
  0xf9   :  { %vm426_vm1 = vcmp.eq.s32.totalorder %v1013_v21, %v410_v61  ;;  %vm427_vm11 = vcmp.eq.s32.totalorder %v1016_v22, %v410_v61  ;;  %vm428_vm12 = vcmp.eq.s32.totalorder %v1019_v23, %v410_v61  ;;  %v632_v55 = vsel %vm425_vm0, 1.0, %v732_v7 }
  0xfa   :  { %v633_v12 = vsel %vm426_vm1, 1.0, %v732_v7  ;;  %v634_v15 = vsel %vm427_vm11, 1.0, %v732_v7  ;;  %v635_v16 = vsel %vm428_vm12, 1.0, %v732_v7  ;;  %v621_v18 = vsel %vm414_vm6, 1.0, %v732_v7 }
  0xfb   :  { %vm415_vm13 = vcmp.eq.s32.totalorder %v980_v60, %v410_v61  ;;  %vm416_vm14 = vcmp.eq.s32.totalorder %v983_v2, %v410_v61  ;;  %vm417_vm15 = vcmp.eq.s32.totalorder %v986_v6, %v410_v61  ;;  %vm418_vm2 = vcmp.eq.s32.totalorder %v989_v9, %v410_v61 }
  0xfc   :  { %v622_v19 = vsel %vm415_vm13, 1.0, %v732_v7  ;;  %v623_v20 = vsel %vm416_vm14, 1.0, %v732_v7  ;;  %v624_v21 = vsel %vm417_vm15, 1.0, %v732_v7  ;;  %v625_v22 = vsel %vm418_vm2, 1.0, %v732_v7 }
  0xfd   :  { %vm419_vm3 = vcmp.eq.s32.totalorder %v992_v10, %v410_v61  ;;  %vm420_vm4 = vcmp.eq.s32.totalorder %v995_v11, %v410_v61  ;;  %vm1157_vm5 = vcmask 261120   ;;  %vm551_vm9 = vcmask 0  }
  0xfe   :  { %v626_v58 = vsel %vm419_vm3, 1.0, %v732_v7  ;;  %v627_v60 = vsel %vm420_vm4, 1.0, %v732_v7  ;;  %vm1158_vm6 = vmmov %vm1157_vm5 }
  0xff   :  { %vm1159_vm7 = vmmov %vm1157_vm5 }
 0x100   :  { %478 = vxpose.xlu1.b32.cont [2/16] (narrow) %v621_v18, 16  ;;  %vm1160_vm8 = vmmov %vm1157_vm5 }
 0x108   :  { %479 = vxpose.xlu1.b32.cont [3/16] (narrow) %v622_v19, 16 }
 0x110   :  { %480 = vxpose.xlu1.b32.cont [4/16] (narrow) %v623_v20, 16 }
 0x118   :  { %481 = vxpose.xlu1.b32.cont [5/16] (narrow) %v624_v21, 16 }
 0x120   :  { %482 = vxpose.xlu1.b32.cont [6/16] (narrow) %v625_v22, 16 }
 0x128   :  { %483 = vxpose.xlu1.b32.cont [7/16] (narrow) %v626_v58, 16 }
 0x130   :  { %484 = vxpose.xlu1.b32.cont [8/16] (narrow) %v627_v60, 16 }
 0x138   :  { %485 = vxpose.xlu1.b32.cont [9/16] (narrow) %v628_v62, 16 }
 0x140   :  { %486 = vxpose.xlu1.b32.cont [10/16] (narrow) %v629_v1, 16 }
 0x148   :  { %487 = vxpose.xlu1.b32.cont [11/16] (narrow) %v630_v13, 16 }
 0x150   :  { %488 = vxpose.xlu1.b32.cont [12/16] (narrow) %v631_v8, 16 }
 0x158   :  { %489 = vxpose.xlu1.b32.cont [13/16] (narrow) %v632_v55, 16 }
 0x160   :  { %490 = vxpose.xlu1.b32.cont [14/16] (narrow) %v633_v12, 16 }
 0x168   :  { %491 = vxpose.xlu1.b32.cont [15/16] (narrow) %v634_v15, 16 }
 0x170   :  { %492 = vxpose.xlu1.b32.end [16/16] (narrow) %v635_v16, 16 }
 0x19c   :  { %v493_v2 = vpop.trf.xlu1 }
 0x19d   :  { %525 = vmatmul.f32.vlgmr.msra.gmra.mxu1 %v493_v2 }
 0x1a4   :  { %v494_v6 = vpop.trf.xlu1 }
 0x1a5   :  { %528 = vmatmul.f32.gmra.mxu1 %v494_v6 }
 0x21a   :  { %v526_v9 = vpop.f32.mrf.mxu1 }
 0x21b   :  { %532 = vst.msk [vmem:[#allocation2] sm:$0xff] %vm1157_vm5, %v526_v9  ;;  %v534_v10 = vsub.f32 %v526_v9, %v788_v4 }
 0x21d   :  { %v536_v23 = vmul.f32 %v534_v10, %v534_v10 }
 0x21f   :  { %v538_v34 = vsel %vm1159_vm7, %v536_v23, 0.0 }
 0x222   :  { %v529_v11 = vpop.f32.mrf.mxu1 }
 0x223   :  { %533 = vst.msk [vmem:[#allocation2 + $0x8] sm:$0xff] %vm1158_vm6, %v529_v11  ;;  %v535_v5 = vsub.f32 %v529_v11, %v771_v0 }
 0x224   :  { %565 = dma.vmem_to_hbm [thread:$0]  %s558_s7, 256, %s560_s10, [#allocation3], %s734_s11, %s734_s11, %s735_s12  }
 0x225   :  { %v537_v32 = vmul.f32 %v535_v5, %v535_v5 }
 0x227   :  { %v539_v17 = vsel %vm1160_vm8, %v537_v32, 0.0 }
 0x228   :  { %v540_v35 = vadd.f32 %v539_v17, %v538_v34 }
 0x22a   :  { %541 = vadd.xlane.f32.xlu2 %v540_v35 }
 0x29d   :  { %v542_v4 = vpop.xlane.xlu2 %541 }
 0x29e   :  { %v543_v0 = vrot.slane %v542_v4, 4 }
 0x2a0   :  { %v544_v26 = vadd.f32 %v543_v0, %v542_v4 }
 0x2a2   :  { %v545_v36 = vrot.slane %v544_v26, 2 }
 0x2a4   :  { %v546_v24 = vadd.f32 %v545_v36, %v544_v26 }
 0x2a6   :  { %v547_v33 = vrot.slane %v546_v24, 1 }
 0x2a8   :  { %v548_v37 = vadd.f32 %v547_v33, %v546_v24 }
 0x2aa   :  { %643 = vpush %v548_v37 }
 0x2db   :  { %s644_s22 = spop %643 }
 0x2dc   :  { %v550_v25 = vstv %s644_s22 }
 0x2dd   :  { %552 = vst.msk [vmem:[#allocation4] sm:$0x1] %vm551_vm9, %v550_v25 }
 0x2de   :  { %576 = dma.vmem_to_hbm [thread:$0]  %s572_s17, 16, %s574_s15, [#allocation5]  }
 0x2df   :  { %587 = dma.vmem_to_hbm [thread:$0]  %s583_s18, 16, %s585_s21, [#allocation5]  }
 0x2e0   :  { %727 = dma.done.wait [#allocation3], 256  }
 0x2e1   :  { %728 = vsyncadd [#allocation3], 4294967040 }
 0x2e2   :  { %729 = dma.done.wait [#allocation5], 32  }
 0x2e3   :  { %730 = vsyncadd [#allocation5], 4294967264 }
 0x2e4   :  { %600 = vsyncpa [#allocation3], 1 }
 0x2e5   :  { %601 = vsyncpa [#allocation5], 1 }

// kernel: tpu_custom_call.1
= control target key start
LH: loop header
LB: loop body
LE: loop exit
PB: predicated region body
PF: predicated region fallthrough
CT: control target
= control target key end

     0   :  { %11 = vsyncpa [#allocation3], 0  ;;  %vm1140_vm0 = vcmask 261120   ;;  %v731_v2 = vmov 0   ;;  %s1134_s0 = inlined_call_operand.vmem [shape: f32[16,32], index: 0, kind: input, shape index: {}]   ;;  %s1135_s1 = inlined_call_operand.vmem [shape: f32[128,32], index: 1, kind: input, shape index: {}]   ;;  %s1136_s2 = inlined_call_operand.vmem [shape: f32[128,1], index: 2, kind: input, shape index: {}]   ;;  %s1137_s3 = inlined_call_operand.hbm [shape: f32[16,32], index: 3, kind: output, shape index: {0}]   ;;  %s1138_s4 = inlined_call_operand.hbm [shape: f32[1,1,1], index: 4, kind: output, shape index: {1}]   ;;  %s1139_s5 = inlined_call_operand.hbm [shape: s32[1,1,16], index: 5, kind: output, shape index: {2}]  }
   0x1   :  { %v771_v0 = vld [vmem:[%s1134_s0 + $0x8] sm:$0xff]  ;;  %v157_v1 = vld [vmem:[%s1136_s2] sm:$0xff]  ;;  %652 = vset.pattern.permute.xlu0 %v731_v2  ;;  %v159_v3 = vld [vmem:[%s1136_s2 + $0x10] sm:$0xff]  ;;  %653 = vset.pattern.permute.xlu1 %v731_v2 }
   0x2   :  { %602 = vmatpush.xpose.msk.msra.mxu0 %vm1140_vm0, %v771_v0  ;;  %636 = vmatpush.xpose.msk.msra.mxu2 %vm1140_vm0, %v771_v0  ;;  %v788_v4 = vld [vmem:[%s1134_s0] sm:$0xff]  ;;  %v26_v6 = vld [vmem:[%s1135_s1 + $0x28] sm:$0xff]  ;;  %v32_v7 = vld [vmem:[%s1135_s1 + $0x58] sm:$0xff] }
   0x3   :  { %637 = vmatpush.xpose.msk.msra.mxu3 %vm1140_vm0, %v771_v0  ;;  %175 = vperm.xlu0 %652, %v157_v1   ;;  %v795_v5 = vld [vmem:[%s1135_s1] sm:$0xff]  ;;  %v158_v9 = vld [vmem:[%s1136_s2 + $0x8] sm:$0xff]  ;;  %v160_v10 = vld [vmem:[%s1136_s2 + $0x18] sm:$0xff] }
   0x4   :  { %185 = vperm.xlu1 %653, %v159_v3   ;;  %654 = vset.pattern.permute.xlu2 %v731_v2  ;;  %v161_v8 = vld [vmem:[%s1136_s2 + $0x20] sm:$0xff]  ;;  %v823_v11 = vld [vmem:[%s1135_s1 + $0x78] sm:$0xff] }
   0x5   :  { %195 = vperm.xlu2 %654, %v161_v8   ;;  %509 = vmatpush.msra.mxu1 %v823_v11 }
   0x6   :  { %603 = vmatpush.xpose.msk.msra.mxu0 %vm1140_vm0, %v788_v4  ;;  %638 = vmatpush.xpose.msk.msra.mxu2 %vm1140_vm0, %v788_v4 }
   0x7   :  { %639 = vmatpush.xpose.msk.msra.mxu3 %vm1140_vm0, %v788_v4 }
   0x9   :  { %604 = vmatmul.msk.f32.vlgmr.msra.gmra.mxu0 %vm1140_vm0, %v795_v5  ;;  %609 = vmatmul.msk.f32.vlgmr.msra.gmra.mxu2 %vm1140_vm0, %v26_v6 }
   0xa   :  { %615 = vmatmul.msk.f32.vlgmr.msra.gmra.mxu3 %vm1140_vm0, %v32_v7 }
   0xb   :  { %12 = vsyncpa [#allocation5], 0  ;;  %180 = vperm.xlu0 %652, %v158_v9   ;;  %v35_v12 = vld [vmem:[%s1135_s1 + $0x70] sm:$0xff]  ;;  %v162_v13 = vld [vmem:[%s1136_s2 + $0x28] sm:$0xff]  ;;  %vm1141_vm1 = vcmask 130048   ;;  %s559_s10 = sshll.u32 %s1137_s3, 4  ;;  %s560_s10 = int_to_ptr.hbm [resolvable:$true] %s559_s10 }
   0xc   :  { %190 = vperm.xlu1 %653, %v160_v10   ;;  %510 = vmatpush.msra.mxu1 %v35_v12  ;;  %v22_v14 = vld [vmem:[%s1135_s1 + $0x8] sm:$0xff]  ;;  %v27_v16 = vld [vmem:[%s1135_s1 + $0x30] sm:$0xff]  ;;  %v33_v17 = vld [vmem:[%s1135_s1 + $0x60] sm:$0xff]  ;;  %s734_s11 = smov 128   ;;  %s735_s12 = smov 8  }
   0xd   :  { %v34_v15 = vld [vmem:[%s1135_s1 + $0x68] sm:$0xff]  ;;  %200 = vperm.xlu2 %654, %v162_v13   ;;  %v163_v18 = vld [vmem:[%s1136_s2 + $0x30] sm:$0xff]  ;;  %v164_v19 = vld [vmem:[%s1136_s2 + $0x38] sm:$0xff]  ;;  %s573_s15 = sshll.u32 %s1138_s4, 4  ;;  %s736_s16 = smov [#allocation4]   ;;  %s574_s15 = int_to_ptr.hbm [resolvable:$true] %s573_s15 }
   0xe   :  { %511 = vmatpush.msra.mxu1 %v34_v15  ;;  %v31_v20 = vld [vmem:[%s1135_s1 + $0x50] sm:$0xff]  ;;  %v165_v21 = vld [vmem:[%s1136_s2 + $0x40] sm:$0xff]  ;;  %v30_v23 = vld [vmem:[%s1135_s1 + $0x48] sm:$0xff]  ;;  %s571_s17 = sshll.u32 %s736_s16, 4  ;;  %s737_s3 = smov [#allocation6]   ;;  %s572_s17 = int_to_ptr.vmem [resolvable:$true] %s571_s17 }
   0xf   :  { %v23_v22 = vld [vmem:[%s1135_s1 + $0x10] sm:$0xff]  ;;  %v28_v24 = vld [vmem:[%s1135_s1 + $0x38] sm:$0xff]  ;;  %v29_v25 = vld [vmem:[%s1135_s1 + $0x40] sm:$0xff]  ;;  %s582_s18 = sshll.u32 %s737_s3, 4  ;;  %s584_s21 = sshll.u32 %s1139_s5, 4  ;;  %s583_s18 = int_to_ptr.vmem [resolvable:$true] %s582_s18  ;;  %s585_s21 = int_to_ptr.hbm [resolvable:$true] %s584_s21 }
  0x10   :  { %512 = vmatpush.msra.mxu1 %v33_v17  ;;  %v166_v26 = vld [vmem:[%s1136_s2 + $0x48] sm:$0xff]  ;;  %v167_v27 = vld [vmem:[%s1136_s2 + $0x50] sm:$0xff]  ;;  %v168_v28 = vld [vmem:[%s1136_s2 + $0x58] sm:$0xff] }
  0x11   :  { %605 = vmatmul.msk.f32.gmra.mxu0 %vm1140_vm0, %v22_v14  ;;  %610 = vmatmul.msk.f32.gmra.mxu2 %vm1140_vm0, %v27_v16  ;;  %v24_v29 = vld [vmem:[%s1135_s1 + $0x18] sm:$0xff]  ;;  %v25_v30 = vld [vmem:[%s1135_s1 + $0x20] sm:$0xff]  ;;  %v170_v32 = vld [vmem:[%s1136_s2 + $0x68] sm:$0xff] }
  0x12   :  { %616 = vmatmul.msk.f32.gmra.mxu3 %vm1140_vm0, %v33_v17  ;;  %513 = vmatpush.msra.mxu1 %v32_v7  ;;  %v169_v31 = vld [vmem:[%s1136_s2 + $0x60] sm:$0xff]  ;;  %v171_v33 = vld [vmem:[%s1136_s2 + $0x70] sm:$0xff]  ;;  %v172_v34 = vld [vmem:[%s1136_s2 + $0x78] sm:$0xff]  ;;  %s733_s2 = smov [#allocation2]  }
  0x13   :  { %205 = vperm.xlu0 %652, %v163_v18   ;;  %s557_s7 = sshll.u32 %s733_s2, 4  ;;  %s558_s7 = int_to_ptr.vmem [resolvable:$true] %s557_s7 }
  0x14   :  { %210 = vperm.xlu1 %653, %v164_v19   ;;  %514 = vmatpush.msra.mxu1 %v31_v20 }
  0x15   :  { %215 = vperm.xlu2 %654, %v165_v21  }
  0x16   :  { %515 = vmatpush.msra.mxu1 %v30_v23 }
  0x18   :  { %516 = vmatpush.msra.mxu1 %v29_v25 }
  0x19   :  { %606 = vmatmul.msk.f32.gmra.mxu0 %vm1140_vm0, %v23_v22  ;;  %611 = vmatmul.msk.f32.gmra.mxu2 %vm1140_vm0, %v28_v24 }
  0x1a   :  { %617 = vmatmul.msk.f32.gmra.mxu3 %vm1140_vm0, %v34_v15  ;;  %517 = vmatpush.msra.mxu1 %v28_v24 }
  0x1b   :  { %220 = vperm.xlu0 %652, %v166_v26  }
  0x1c   :  { %225 = vperm.xlu1 %653, %v167_v27   ;;  %518 = vmatpush.msra.mxu1 %v27_v16 }
  0x1d   :  { %230 = vperm.xlu2 %654, %v168_v28  }
  0x1e   :  { %519 = vmatpush.msra.mxu1 %v26_v6 }
  0x20   :  { %520 = vmatpush.msra.mxu1 %v25_v30 }
  0x21   :  { %607 = vmatmul.msk.f32.gmra.mxu0 %vm1140_vm0, %v24_v29  ;;  %612 = vmatmul.msk.f32.gmra.mxu2 %vm1140_vm0, %v29_v25 }
  0x22   :  { %618 = vmatmul.msk.f32.gmra.mxu3 %vm1140_vm0, %v35_v12  ;;  %521 = vmatpush.msra.mxu1 %v24_v29 }
  0x23   :  { %235 = vperm.xlu0 %652, %v169_v31  }
  0x24   :  { %240 = vperm.xlu1 %653, %v170_v32   ;;  %522 = vmatpush.msra.mxu1 %v23_v22 }
  0x25   :  { %245 = vperm.xlu2 %654, %v171_v33  }
  0x26   :  { %523 = vmatpush.msra.mxu1 %v22_v14 }
  0x28   :  { %524 = vmatpush.msra.mxu1 %v795_v5 }
  0x29   :  { %608 = vmatmul.msk.f32.gmra.mxu0 %vm1140_vm0, %v25_v30  ;;  %613 = vmatmul.msk.f32.gmra.mxu2 %vm1140_vm0, %v30_v23 }
  0x2a   :  { %619 = vmatmul.msk.f32.gmra.mxu3 %vm1140_vm0, %v823_v11 }
  0x2b   :  { %250 = vperm.xlu0 %652, %v172_v34  }
  0x31   :  { %614 = vmatmul.msk.f32.gmra.mxu2 %vm1140_vm0, %v31_v20 }
  0x5f   :  { %v196_v39 = vpop.permute.xlu2 %195 }
  0x67   :  { %v201_v48 = vpop.permute.xlu2 %200 }
  0x6f   :  { %v216_v54 = vpop.permute.xlu2 %215 }
  0x75   :  { %v176_v35 = vpop.permute.xlu0 %175 }
  0x76   :  { %v186_v37 = vpop.permute.xlu1 %185 }
  0x77   :  { %v231_v60 = vpop.permute.xlu2 %230 }
  0x7d   :  { %v181_v38 = vpop.permute.xlu0 %180 }
  0x7e   :  { %v191_v43 = vpop.permute.xlu1 %190 }
  0x7f   :  { %v246_v27 = vpop.permute.xlu2 %245 }
  0x85   :  { %v206_v44 = vpop.permute.xlu0 %205 }
  0x86   :  { %v109_v36 = vpop.f32.mrf.mxu0  ;;  %v211_v51 = vpop.permute.xlu1 %210 }
  0x87   :  { %v914_v63 = vsub.f32 %v176_v35, %v109_v36 }
  0x89   :  { %v270_v10 = vsel %vm1141_vm1, %v914_v63, inf }
  0x8c   :  { %v124_v40 = vpop.f32.mrf.mxu2 }
  0x8d   :  { %v142_v41 = vpop.f32.mrf.mxu3  ;;  %v221_v52 = vpop.permute.xlu0 %220  ;;  %v916_v1 = vsub.f32 %v201_v48, %v124_v40 }
  0x8e   :  { %v112_v42 = vpop.f32.mrf.mxu0  ;;  %v226_v57 = vpop.permute.xlu1 %225  ;;  %v942_v17 = vsub.f32 %v231_v60, %v142_v41 }
  0x8f   :  { %v910_v61 = vsub.f32 %v181_v38, %v112_v42  ;;  %v276_v11 = vsel %vm1141_vm1, %v916_v1, inf }
  0x91   :  { %v271_v6 = vsel %vm1141_vm1, %v910_v61, inf }
  0x92   :  { %v277_v18 = vmin.f32 %v271_v6, %v276_v11 }
  0x94   :  { %v127_v45 = vpop.f32.mrf.mxu2 }
  0x95   :  { %v145_v46 = vpop.f32.mrf.mxu3  ;;  %v236_v58 = vpop.permute.xlu0 %235  ;;  %v934_v13 = vsub.f32 %v206_v44, %v127_v45 }
  0x96   :  { %v115_v47 = vpop.f32.mrf.mxu0  ;;  %v241_v19 = vpop.permute.xlu1 %240  ;;  %v952_v26 = vsub.f32 %v236_v58, %v145_v46 }
  0x97   :  { %v924_v7 = vsub.f32 %v186_v37, %v115_v47  ;;  %v278_v31 = vsel %vm1141_vm1, %v934_v13, inf  ;;  %v288_v37 = vsel %vm1141_vm1, %v942_v17, inf }
  0x98   :  { %v290_v44 = vsel %vm1141_vm1, %v952_v26, inf }
  0x99   :  { %v272_v22 = vsel %vm1141_vm1, %v924_v7, inf }
  0x9a   :  { %v279_v35 = vmin.f32 %v272_v22, %v278_v31 }
  0x9c   :  { %v130_v49 = vpop.f32.mrf.mxu2 }
  0x9d   :  { %v148_v50 = vpop.f32.mrf.mxu3  ;;  %v926_v8 = vsub.f32 %v211_v51, %v130_v49  ;;  %v251_v20 = vpop.permute.xlu0 %250 }
  0x9e   :  { %v118_v53 = vpop.f32.mrf.mxu0  ;;  %v948_v24 = vsub.f32 %v241_v19, %v148_v50 }
  0x9f   :  { %v918_v3 = vsub.f32 %v191_v43, %v118_v53  ;;  %v280_v23 = vsel %vm1141_vm1, %v926_v8, inf }
  0xa0   :  { %v292_v38 = vsel %vm1141_vm1, %v948_v24, inf }
  0xa1   :  { %v273_v14 = vsel %vm1141_vm1, %v918_v3, inf }
  0xa2   :  { %v281_v28 = vmin.f32 %v273_v14, %v280_v23 }
  0xa4   :  { %v133_v55 = vpop.f32.mrf.mxu2  ;;  %v289_v42 = vmin.f32 %v281_v28, %v288_v37 }
  0xa5   :  { %v151_v56 = vpop.f32.mrf.mxu3  ;;  %v938_v15 = vsub.f32 %v216_v54, %v133_v55 }
  0xa6   :  { %v121_v59 = vpop.f32.mrf.mxu0  ;;  %v958_v33 = vsub.f32 %v246_v27, %v151_v56 }
  0xa7   :  { %v912_v62 = vsub.f32 %v196_v39, %v121_v59  ;;  %v282_v32 = vsel %vm1141_vm1, %v938_v15, inf }
  0xa8   :  { %v294_v45 = vsel %vm1141_vm1, %v958_v33, inf }
  0xa9   :  { %v274_v9 = vsel %vm1141_vm1, %v912_v62, inf }
  0xaa   :  { %v275_v21 = vmin.f32 %v270_v10, %v274_v9 }
  0xac   :  { %v136_v2 = vpop.f32.mrf.mxu2  ;;  %v283_v36 = vmin.f32 %v275_v21, %v282_v32 }
  0xad   :  { %v920_v5 = vsub.f32 %v221_v52, %v136_v2  ;;  %v154_v12 = vpop.f32.mrf.mxu3  ;;  %v307_v52 = vlaneseq }
  0xae   :  { %v950_v25 = vsub.f32 %v251_v20, %v154_v12  ;;  %v291_v46 = vmin.f32 %v283_v36, %v290_v44 }
  0xaf   :  { %v284_v16 = vsel %vm1141_vm1, %v920_v5, inf  ;;  %v974_v55 = vshrl.u32 %v307_v52, 7 }
  0xb0   :  { %v285_v29 = vmin.f32 %v277_v18, %v284_v16  ;;  %v296_v39 = vsel %vm1141_vm1, %v950_v25, inf }
  0xb1   :  { %v297_v47 = vmin.f32 %v289_v42, %v296_v39  ;;  %v977_v58 = vadd.s32 8, %v974_v55  ;;  %v980_v60 = vadd.s32 16, %v974_v55  ;;  %v983_v2 = vadd.s32 24, %v974_v55 }
  0xb2   :  { %v293_v41 = vmin.f32 %v285_v29, %v292_v38  ;;  %v986_v6 = vadd.s32 32, %v974_v55  ;;  %v989_v9 = vadd.s32 40, %v974_v55  ;;  %v992_v10 = vadd.s32 48, %v974_v55 }
  0xb3   :  { %v995_v11 = vadd.s32 56, %v974_v55  ;;  %v998_v12 = vadd.s32 64, %v974_v55  ;;  %v1001_v16 = vadd.s32 72, %v974_v55  ;;  %v1004_v18 = vadd.s32 80, %v974_v55 }
  0xb4   :  { %v139_v30 = vpop.f32.mrf.mxu2  ;;  %v298_v49 = vmin.f32 %v291_v46, %v293_v41  ;;  %v1007_v19 = vadd.s32 88, %v974_v55  ;;  %v1010_v20 = vadd.s32 96, %v974_v55  ;;  %v1013_v21 = vadd.s32 104, %v974_v55 }
  0xb5   :  { %v960_v34 = vsub.f32 %v226_v57, %v139_v30  ;;  %v1016_v22 = vadd.s32 112, %v974_v55  ;;  %v1019_v23 = vadd.s32 120, %v974_v55 }
  0xb7   :  { %v286_v40 = vsel %vm1141_vm1, %v960_v34, inf }
  0xb8   :  { %v287_v43 = vmin.f32 %v279_v35, %v286_v40 }
  0xba   :  { %v295_v48 = vmin.f32 %v287_v43, %v294_v45 }
  0xbc   :  { %v299_v50 = vmin.f32 %v295_v48, %v297_v47 }
  0xbe   :  { %v300_v51 = vmin.f32 %v298_v49, %v299_v50 }
  0xc0   :  { %v301_v53 = vrot.slane %v300_v51, 4 }
  0xc2   :  { %v302_v54 = vmin.f32 %v300_v51, %v301_v53 }
  0xc4   :  { %v303_v56 = vrot.slane %v302_v54, 2 }
  0xc6   :  { %v304_v57 = vmin.f32 %v302_v54, %v303_v56 }
  0xc8   :  { %v305_v59 = vrot.slane %v304_v57, 1 }
  0xca   :  { %v306_v14 = vmin.f32 %v304_v57, %v305_v59 }
  0xcc   :  { %vm324_vm2 = vcmp.eq.f32.partialorder %v914_v63, %v306_v14  ;;  %vm325_vm3 = vcmp.eq.f32.partialorder %v910_v61, %v306_v14  ;;  %vm326_vm4 = vcmp.eq.f32.partialorder %v924_v7, %v306_v14  ;;  %vm327_vm5 = vcmp.eq.f32.partialorder %v918_v3, %v306_v14 }
  0xcd   :  { %vm328_vm6 = vcmp.eq.f32.partialorder %v912_v62, %v306_v14  ;;  %vm329_vm7 = vcmp.eq.f32.partialorder %v916_v1, %v306_v14  ;;  %vm330_vm8 = vcmp.eq.f32.partialorder %v934_v13, %v306_v14  ;;  %vm331_vm9 = vcmp.eq.f32.partialorder %v926_v8, %v306_v14 }
  0xce   :  { %vm332_vm10 = vcmp.eq.f32.partialorder %v938_v15, %v306_v14  ;;  %vm333_vm11 = vcmp.eq.f32.partialorder %v920_v5, %v306_v14  ;;  %vm334_vm12 = vcmp.eq.f32.partialorder %v960_v34, %v306_v14  ;;  %vm335_vm13 = vcmp.eq.f32.partialorder %v942_v17, %v306_v14 }
  0xcf   :  { %vm336_vm14 = vcmp.eq.f32.partialorder %v952_v26, %v306_v14  ;;  %vm337_vm15 = vcmp.eq.f32.partialorder %v948_v24, %v306_v14  ;;  %vm338_vm0 = vcmp.eq.f32.partialorder %v958_v33, %v306_v14  ;;  %vm339_vm1 = vcmp.eq.f32.partialorder %v950_v25, %v306_v14 }
  0xd0   :  { %v340_v27 = vsel %vm324_vm2, %v974_v55, 128  ;;  %v341_v28 = vsel %vm325_vm3, %v977_v58, 128  ;;  %v342_v29 = vsel %vm326_vm4, %v980_v60, 128  ;;  %v343_v30 = vsel %vm327_vm5, %v983_v2, 128 }
  0xd1   :  { %v344_v31 = vsel %vm328_vm6, %v986_v6, 128  ;;  %v345_v63 = vsel %vm329_vm7, %v989_v9, 128  ;;  %v346_v61 = vsel %vm330_vm8, %v992_v10, 128  ;;  %v347_v7 = vsel %vm331_vm9, %v995_v11, 128 }
  0xd2   :  { %v348_v3 = vsel %vm332_vm10, %v998_v12, 128  ;;  %v349_v62 = vsel %vm333_vm11, %v1001_v16, 128  ;;  %v350_v1 = vsel %vm334_vm12, %v1004_v18, 128  ;;  %v351_v13 = vsel %vm335_vm13, %v1007_v19, 128 }
  0xd3   :  { %v352_v8 = vsel %vm336_vm14, %v1010_v20, 128  ;;  %v353_v15 = vsel %vm337_vm15, %v1013_v21, 128  ;;  %v354_v5 = vsel %vm338_vm0, %v1016_v22, 128  ;;  %v355_v32 = vsel %vm339_vm1, %v1019_v23, 128 }
  0xd4   :  { %vm1142_vm2 = vcmask 130048  }
  0xd5   :  { %v356_v34 = vsel %vm1142_vm2, %v340_v27, 2147483647  ;;  %vm1143_vm3 = vmmov %vm1142_vm2 }
  0xd6   :  { %v357_v17 = vsel %vm1143_vm3, %v341_v28, 2147483647  ;;  %vm1144_vm4 = vmmov %vm1142_vm2 }
  0xd7   :  { %v358_v35 = vsel %vm1144_vm4, %v342_v29, 2147483647  ;;  %vm1145_vm5 = vmmov %vm1142_vm2 }
  0xd8   :  { %v359_v26 = vsel %vm1145_vm5, %v343_v30, 2147483647  ;;  %vm1146_vm6 = vmmov %vm1142_vm2 }
  0xd9   :  { %v360_v36 = vsel %vm1146_vm6, %v344_v31, 2147483647  ;;  %vm1147_vm7 = vmmov %vm1142_vm2 }
  0xda   :  { %v363_v24 = vsel %vm1147_vm7, %v345_v63, 2147483647  ;;  %vm361_vm8 = vcmp.lt.s32.totalorder %v356_v34, %v360_v36  ;;  %vm1148_vm10 = vmmov %vm1142_vm2 }
  0xdb   :  { %vm364_vm9 = vcmp.lt.s32.totalorder %v357_v17, %v363_v24  ;;  %v366_v33 = vsel %vm1148_vm10, %v346_v61, 2147483647  ;;  %vm1149_vm0 = vmmov %vm1142_vm2  ;;  %v362_v25 = vsel %vm361_vm8, %v356_v34, %v360_v36 }
  0xdc   :  { %v369_v37 = vsel %vm1149_vm0, %v347_v7, 2147483647  ;;  %v365_v38 = vsel %vm364_vm9, %v357_v17, %v363_v24  ;;  %vm367_vm1 = vcmp.lt.s32.totalorder %v358_v35, %v366_v33  ;;  %vm1150_vm12 = vmmov %vm1149_vm0  ;;  %v393_v52 = vsel %vm1149_vm0, %v355_v32, 2147483647 }
  0xdd   :  { %vm370_vm11 = vcmp.lt.s32.totalorder %v359_v26, %v369_v37  ;;  %v368_v39 = vsel %vm367_vm1, %v358_v35, %v366_v33  ;;  %v372_v41 = vsel %vm1150_vm12, %v348_v3, 2147483647  ;;  %vm1151_vm13 = vmmov %vm1149_vm0  ;;  %v732_v7 = vmov 0.0  }
  0xde   :  { %v371_v40 = vsel %vm370_vm11, %v359_v26, %v369_v37  ;;  %v375_v42 = vsel %vm1151_vm13, %v349_v62, 2147483647  ;;  %vm373_vm14 = vcmp.lt.s32.totalorder %v362_v25, %v372_v41  ;;  %vm1152_vm2 = vmmov %vm1149_vm0 }
  0xdf   :  { %vm376_vm15 = vcmp.lt.s32.totalorder %v365_v38, %v375_v42  ;;  %v378_v43 = vsel %vm1152_vm2, %v350_v1, 2147483647  ;;  %vm1153_vm3 = vmmov %vm1149_vm0  ;;  %v374_v45 = vsel %vm373_vm14, %v362_v25, %v372_v41 }
  0xe0   :  { %v381_v44 = vsel %vm1153_vm3, %v351_v13, 2147483647  ;;  %v377_v46 = vsel %vm376_vm15, %v365_v38, %v375_v42  ;;  %vm379_vm4 = vcmp.lt.s32.totalorder %v368_v39, %v378_v43  ;;  %vm1154_vm6 = vmmov %vm1149_vm0  ;;  %vm411_vm3 = vcmask 122880  }
  0xe1   :  { %vm382_vm5 = vcmp.lt.s32.totalorder %v371_v40, %v381_v44  ;;  %v380_v47 = vsel %vm379_vm4, %v368_v39, %v378_v43  ;;  %v384_v49 = vsel %vm1154_vm6, %v352_v8, 2147483647  ;;  %vm1155_vm7 = vmmov %vm1149_vm0 }
  0xe2   :  { %v383_v48 = vsel %vm382_vm5, %v371_v40, %v381_v44  ;;  %v387_v50 = vsel %vm1155_vm7, %v353_v15, 2147483647  ;;  %vm385_vm8 = vcmp.lt.s32.totalorder %v374_v45, %v384_v49  ;;  %vm1156_vm10 = vmmov %vm1149_vm0 }
  0xe3   :  { %vm388_vm9 = vcmp.lt.s32.totalorder %v377_v46, %v387_v50  ;;  %v390_v51 = vsel %vm1156_vm10, %v354_v5, 2147483647  ;;  %v386_v53 = vsel %vm385_vm8, %v374_v45, %v384_v49  ;;  %vm394_vm11 = vcmp.lt.s32.totalorder %v383_v48, %v393_v52 }
  0xe4   :  { %v389_v54 = vsel %vm388_vm9, %v377_v46, %v387_v50  ;;  %vm391_vm1 = vcmp.lt.s32.totalorder %v380_v47, %v390_v51  ;;  %v395_v57 = vsel %vm394_vm11, %v383_v48, %v393_v52 }
  0xe5   :  { %v392_v56 = vsel %vm391_vm1, %v380_v47, %v390_v51  ;;  %vm396_vm12 = vcmp.lt.s32.totalorder %v386_v53, %v389_v54 }
  0xe6   :  { %v397_v59 = vsel %vm396_vm12, %v386_v53, %v389_v54  ;;  %vm398_vm13 = vcmp.lt.s32.totalorder %v392_v56, %v395_v57 }
  0xe7   :  { %v399_v14 = vsel %vm398_vm13, %v392_v56, %v395_v57 }
  0xe8   :  { %vm400_vm14 = vcmp.lt.s32.totalorder %v397_v59, %v399_v14 }
  0xe9   :  { %v401_v27 = vsel %vm400_vm14, %v397_v59, %v399_v14 }
  0xea   :  { %v402_v28 = vrot.slane %v401_v27, 4 }
  0xec   :  { %vm403_vm15 = vcmp.lt.s32.totalorder %v401_v27, %v402_v28 }
  0xed   :  { %v404_v29 = vsel %vm403_vm15, %v401_v27, %v402_v28 }
  0xee   :  { %v405_v30 = vrot.slane %v404_v29, 2 }
  0xf0   :  { %vm406_vm2 = vcmp.lt.s32.totalorder %v404_v29, %v405_v30 }
  0xf1   :  { %v407_v31 = vsel %vm406_vm2, %v404_v29, %v405_v30 }
  0xf2   :  { %v408_v63 = vrot.slane %v407_v31, 1 }
  0xf4   :  { %vm409_vm4 = vcmp.lt.s32.totalorder %v407_v31, %v408_v63 }
  0xf5   :  { %v410_v61 = vsel %vm409_vm4, %v407_v31, %v408_v63 }
  0xf6   :  { %vm413_vm5 = vcmp.eq.s32.totalorder %v974_v55, %v410_v61  ;;  %412 = vst.msk [vmem:[#allocation6] sm:$0x1] %vm411_vm3, %v410_v61  ;;  %vm414_vm6 = vcmp.eq.s32.totalorder %v977_v58, %v410_v61  ;;  %vm421_vm7 = vcmp.eq.s32.totalorder %v998_v12, %v410_v61  ;;  %vm422_vm8 = vcmp.eq.s32.totalorder %v1001_v16, %v410_v61 }
  0xf7   :  { %v620_v3 = vsel %vm413_vm5, 1.0, %v732_v7  ;;  %vm423_vm9 = vcmp.eq.s32.totalorder %v1004_v18, %v410_v61  ;;  %vm424_vm10 = vcmp.eq.s32.totalorder %v1007_v19, %v410_v61  ;;  %v628_v62 = vsel %vm421_vm7, 1.0, %v732_v7 }
  0xf8   :  { %477 = vxpose.xlu1.b32.start [1/16] (narrow) %v620_v3, 16  ;;  %v629_v1 = vsel %vm422_vm8, 1.0, %v732_v7  ;;  %v630_v13 = vsel %vm423_vm9, 1.0, %v732_v7  ;;  %v631_v8 = vsel %vm424_vm10, 1.0, %v732_v7  ;;  %vm425_vm0 = vcmp.eq.s32.totalorder %v1010_v20, %v410_v61 }
  0xf9   :  { %vm426_vm1 = vcmp.eq.s32.totalorder %v1013_v21, %v410_v61  ;;  %vm427_vm11 = vcmp.eq.s32.totalorder %v1016_v22, %v410_v61  ;;  %vm428_vm12 = vcmp.eq.s32.totalorder %v1019_v23, %v410_v61  ;;  %v632_v55 = vsel %vm425_vm0, 1.0, %v732_v7 }
  0xfa   :  { %v633_v12 = vsel %vm426_vm1, 1.0, %v732_v7  ;;  %v634_v15 = vsel %vm427_vm11, 1.0, %v732_v7  ;;  %v635_v16 = vsel %vm428_vm12, 1.0, %v732_v7  ;;  %v621_v18 = vsel %vm414_vm6, 1.0, %v732_v7 }
  0xfb   :  { %vm415_vm13 = vcmp.eq.s32.totalorder %v980_v60, %v410_v61  ;;  %vm416_vm14 = vcmp.eq.s32.totalorder %v983_v2, %v410_v61  ;;  %vm417_vm15 = vcmp.eq.s32.totalorder %v986_v6, %v410_v61  ;;  %vm418_vm2 = vcmp.eq.s32.totalorder %v989_v9, %v410_v61 }
  0xfc   :  { %v622_v19 = vsel %vm415_vm13, 1.0, %v732_v7  ;;  %v623_v20 = vsel %vm416_vm14, 1.0, %v732_v7  ;;  %v624_v21 = vsel %vm417_vm15, 1.0, %v732_v7  ;;  %v625_v22 = vsel %vm418_vm2, 1.0, %v732_v7 }
  0xfd   :  { %vm419_vm3 = vcmp.eq.s32.totalorder %v992_v10, %v410_v61  ;;  %vm420_vm4 = vcmp.eq.s32.totalorder %v995_v11, %v410_v61  ;;  %vm1157_vm5 = vcmask 261120   ;;  %vm551_vm9 = vcmask 0  }
  0xfe   :  { %v626_v58 = vsel %vm419_vm3, 1.0, %v732_v7  ;;  %v627_v60 = vsel %vm420_vm4, 1.0, %v732_v7  ;;  %vm1158_vm6 = vmmov %vm1157_vm5 }
  0xff   :  { %vm1159_vm7 = vmmov %vm1157_vm5 }
 0x100   :  { %478 = vxpose.xlu1.b32.cont [2/16] (narrow) %v621_v18, 16  ;;  %vm1160_vm8 = vmmov %vm1157_vm5 }
 0x108   :  { %479 = vxpose.xlu1.b32.cont [3/16] (narrow) %v622_v19, 16 }
 0x110   :  { %480 = vxpose.xlu1.b32.cont [4/16] (narrow) %v623_v20, 16 }
 0x118   :  { %481 = vxpose.xlu1.b32.cont [5/16] (narrow) %v624_v21, 16 }
 0x120   :  { %482 = vxpose.xlu1.b32.cont [6/16] (narrow) %v625_v22, 16 }
 0x128   :  { %483 = vxpose.xlu1.b32.cont [7/16] (narrow) %v626_v58, 16 }
 0x130   :  { %484 = vxpose.xlu1.b32.cont [8/16] (narrow) %v627_v60, 16 }
 0x138   :  { %485 = vxpose.xlu1.b32.cont [9/16] (narrow) %v628_v62, 16 }
 0x140   :  { %486 = vxpose.xlu1.b32.cont [10/16] (narrow) %v629_v1, 16 }
 0x148   :  { %487 = vxpose.xlu1.b32.cont [11/16] (narrow) %v630_v13, 16 }
 0x150   :  { %488 = vxpose.xlu1.b32.cont [12/16] (narrow) %v631_v8, 16 }
 0x158   :  { %489 = vxpose.xlu1.b32.cont [13/16] (narrow) %v632_v55, 16 }
 0x160   :  { %490 = vxpose.xlu1.b32.cont [14/16] (narrow) %v633_v12, 16 }
 0x168   :  { %491 = vxpose.xlu1.b32.cont [15/16] (narrow) %v634_v15, 16 }
 0x170   :  { %492 = vxpose.xlu1.b32.end [16/16] (narrow) %v635_v16, 16 }
 0x19c   :  { %v493_v2 = vpop.trf.xlu1 }
 0x19d   :  { %525 = vmatmul.f32.vlgmr.msra.gmra.mxu1 %v493_v2 }
 0x1a4   :  { %v494_v6 = vpop.trf.xlu1 }
 0x1a5   :  { %528 = vmatmul.f32.gmra.mxu1 %v494_v6 }
 0x21a   :  { %v526_v9 = vpop.f32.mrf.mxu1 }
 0x21b   :  { %532 = vst.msk [vmem:[#allocation2] sm:$0xff] %vm1157_vm5, %v526_v9  ;;  %v534_v10 = vsub.f32 %v526_v9, %v788_v4 }
 0x21d   :  { %v536_v23 = vmul.f32 %v534_v10, %v534_v10 }
 0x21f   :  { %v538_v34 = vsel %vm1159_vm7, %v536_v23, 0.0 }
 0x222   :  { %v529_v11 = vpop.f32.mrf.mxu1 }
 0x223   :  { %533 = vst.msk [vmem:[#allocation2 + $0x8] sm:$0xff] %vm1158_vm6, %v529_v11  ;;  %v535_v5 = vsub.f32 %v529_v11, %v771_v0 }
 0x224   :  { %565 = dma.vmem_to_hbm [thread:$0]  %s558_s7, 256, %s560_s10, [#allocation3], %s734_s11, %s734_s11, %s735_s12  }
 0x225   :  { %v537_v32 = vmul.f32 %v535_v5, %v535_v5 }
 0x227   :  { %v539_v17 = vsel %vm1160_vm8, %v537_v32, 0.0 }
 0x228   :  { %v540_v35 = vadd.f32 %v539_v17, %v538_v34 }
 0x22a   :  { %541 = vadd.xlane.f32.xlu2 %v540_v35 }
 0x29d   :  { %v542_v4 = vpop.xlane.xlu2 %541 }
 0x29e   :  { %v543_v0 = vrot.slane %v542_v4, 4 }
 0x2a0   :  { %v544_v26 = vadd.f32 %v543_v0, %v542_v4 }
 0x2a2   :  { %v545_v36 = vrot.slane %v544_v26, 2 }
 0x2a4   :  { %v546_v24 = vadd.f32 %v545_v36, %v544_v26 }
 0x2a6   :  { %v547_v33 = vrot.slane %v546_v24, 1 }
 0x2a8   :  { %v548_v37 = vadd.f32 %v547_v33, %v546_v24 }
 0x2aa   :  { %643 = vpush %v548_v37 }
 0x2db   :  { %s644_s22 = spop %643 }
 0x2dc   :  { %v550_v25 = vstv %s644_s22 }
 0x2dd   :  { %552 = vst.msk [vmem:[#allocation4] sm:$0x1] %vm551_vm9, %v550_v25 }
 0x2de   :  { %576 = dma.vmem_to_hbm [thread:$0]  %s572_s17, 16, %s574_s15, [#allocation5]  }
 0x2df   :  { %587 = dma.vmem_to_hbm [thread:$0]  %s583_s18, 16, %s585_s21, [#allocation5]  }
 0x2e0   :  { %727 = dma.done.wait [#allocation3], 256  }
 0x2e1   :  { %728 = vsyncadd [#allocation3], 4294967040 }
 0x2e2   :  { %729 = dma.done.wait [#allocation5], 32  }
 0x2e3   :  { %730 = vsyncadd [#allocation5], 4294967264 }
 0x2e4   :  { %600 = vsyncpa [#allocation3], 1 }
 0x2e5   :  { %601 = vsyncpa [#allocation5], 1 }

</bundles_post_ra>
